<compile_context>
chip_gen: v6e
topology: v6e:2x2x1
jax: 0.10.0
libtpu: 0.0.40
codegen_flags: <defaults>
</compile_context>

<pallas_src>
import math
import jax
import jax.numpy as jnp
from jax.experimental import pallas as pl
from jax.experimental.pallas import tpu as pltpu

# ----- small synthetic T5 config -----
VOCAB = 128
D_MODEL = 32
N_HEADS = 4
D_KV = 8            # per-head dim (N_HEADS * D_KV == inner dim == 32 here)
D_FF = 64
N_LAYERS = 2
NUM_BUCKETS = 32
MAX_DISTANCE = 128
EPS = 1e-6

QKV_PAD = 128       # fused qkv columns: 3*H*D_KV = 96 -> 128 (zero-padded)
FF_PAD = 128        # ffn hidden: 64 -> 128 (zero-padded)


# ---------------------------------------------------------------------------
# Fused encoder-stack Pallas kernel (grid-less: one step, layers unrolled)
# ---------------------------------------------------------------------------
def t5_encoder_kernel(x_emb_ref, bias_ref,
                      ln1_ref, wqkv_ref, wo_ref,
                      ln2_ref, wi_ref, wff_ref, fin_ref,
                      out_ref):
    BS, D = x_emb_ref.shape                      # (B*S, D_MODEL)
    HB, S, _ = bias_ref.shape                    # (H*B, S, S)
    L = wqkv_ref.shape[0]
    INNER = wo_ref.shape[1]                      # H * D_KV
    B = BS // S
    H = HB // B
    DKV = INNER // H

    # layer-invariant additive bias (rel-pos + mask), loaded once
    bias = bias_ref[...]                         # (H*B, S, S) f32

    x = x_emb_ref[...].astype(jnp.float32)       # resident hidden state

    def rmsnorm(h, scale):                       # T5 RMSNorm (f32)
        var = jnp.mean(h * h, axis=-1, keepdims=True)
        return h * jax.lax.rsqrt(var + EPS) * scale

    def split_heads(flat):                       # (BS, H*DKV) -> (H*B, S, DKV)
        per_head = [flat[:, h * DKV:(h + 1) * DKV] for h in range(H)]
        return jnp.stack(per_head, axis=0).reshape(H * B, S, DKV)

    for l in range(L):                           # unrolled layer loop
        # ---- self-attention sublayer (T5LayerSelfAttention) ----
        xn = rmsnorm(x, ln1_ref[l]).astype(jnp.bfloat16)
        # one fused, lane-padded QKV matmul (BS, D) @ (D, 128) -> f32 acc
        qkv = jnp.dot(xn, wqkv_ref[l], preferred_element_type=jnp.float32)
        q = split_heads(qkv[:, 0:INNER]).astype(jnp.bfloat16)
        k = split_heads(qkv[:, INNER:2 * INNER]).astype(jnp.bfloat16)
        v = split_heads(qkv[:, 2 * INNER:3 * INNER]).astype(jnp.bfloat16)

        # T5: no 1/sqrt(d) scaling; bias carries rel-pos + mask.
        scores = jnp.einsum('xqd,xkd->xqk', q, k,
                            preferred_element_type=jnp.float32) + bias
        m = jnp.max(scores, axis=-1, keepdims=True)
        e = jnp.exp(scores - m)
        p = e * pl.reciprocal(jnp.sum(e, axis=-1, keepdims=True), approx=True)

        ctx = jnp.einsum('xqk,xkd->xqd', p.astype(jnp.bfloat16), v,
                         preferred_element_type=jnp.float32)     # (H*B, S, DKV)
        ctx = ctx.reshape(H, BS, DKV)
        # merge heads back to (BS, H*DKV) and do ONE flat output projection
        ctx_flat = jnp.concatenate([ctx[h] for h in range(H)], axis=-1)
        x = x + jnp.dot(ctx_flat.astype(jnp.bfloat16), wo_ref[l],
                        preferred_element_type=jnp.float32)      # residual

        # ---- feed-forward sublayer (T5LayerFF / DenseReluDense) ----
        xn2 = rmsnorm(x, ln2_ref[l]).astype(jnp.bfloat16)
        h1 = jnp.maximum(
            jnp.dot(xn2, wi_ref[l], preferred_element_type=jnp.float32), 0.0
        ).astype(jnp.bfloat16)                                   # (BS, FF_PAD)
        x = x + jnp.dot(h1, wff_ref[l], preferred_element_type=jnp.float32)

    # ---- final RMSNorm + single output writeback ----
    out_ref[...] = rmsnorm(x, fin_ref[...]).astype(out_ref.dtype)


# ---------------------------------------------------------------------------
# Wrapper: one grid-less pallas_call for the whole encoder stack
# ---------------------------------------------------------------------------
def run_encoder_stack(x_emb, bias, w):
    BS, D = x_emb.shape
    args = (x_emb, bias,
            w["ln1"], w["wqkv"], w["wo"],
            w["ln2"], w["wi"], w["wff"], w["final_ln"])
    vmem = lambda: pl.BlockSpec(memory_space=pltpu.MemorySpace.VMEM)
    return pl.pallas_call(
        t5_encoder_kernel,
        out_shape=jax.ShapeDtypeStruct((BS, D), jnp.float32),
        in_specs=[vmem() for _ in args],       # whole (tiny) arrays VMEM-resident
        out_specs=vmem(),
    )(*args)


# ---------------------------------------------------------------------------
# T5 relative position bias (glue, plain JAX — integer/log bucketing)
# ---------------------------------------------------------------------------
def relative_position_bucket(relative_position, num_buckets=NUM_BUCKETS,
                             max_distance=MAX_DISTANCE):
    # bidirectional (encoder) bucketing, matches HF T5
    num_buckets //= 2
    relative_buckets = (relative_position > 0).astype(jnp.int32) * num_buckets
    relative_position = jnp.abs(relative_position)
    max_exact = num_buckets // 2
    is_small = relative_position < max_exact
    rp_safe = jnp.maximum(relative_position, 1).astype(jnp.float32)
    rel_if_large = max_exact + (
        jnp.log(rp_safe / max_exact)
        / math.log(max_distance / max_exact)
        * (num_buckets - max_exact)
    ).astype(jnp.int32)
    rel_if_large = jnp.minimum(rel_if_large, num_buckets - 1)
    relative_buckets += jnp.where(is_small, relative_position, rel_if_large)
    return relative_buckets


def compute_position_bias(rel_table, S):
    pos = jnp.arange(S)
    rel_pos = pos[None, :] - pos[:, None]                 # memory - query
    buckets = relative_position_bucket(rel_pos)           # (S, S)
    pos_bias = rel_table[buckets]                         # (S, S, H)
    return jnp.transpose(pos_bias, (2, 0, 1))             # (H, S, S)


# ---------------------------------------------------------------------------
# Full encoder forward == encoder_engine(input_ids) -> last_hidden_states
# ---------------------------------------------------------------------------
def t5_encoder_forward(input_ids, attention_mask, params):
    B, S = input_ids.shape
    # TODO(synk): embedding gather could be pulled into the kernel via scalar-
    # prefetched ids + pl.Element row gather; kept as a single XLA gather here.
    x_emb = jnp.take(params["embedding"], input_ids.reshape(-1), axis=0)   # (B*S, D)
    # layer-invariant combined bias, built ONCE here (hoisted out of the kernel)
    pos_bias = compute_position_bias(params["rel_table"], S)               # (H, S, S)
    neg = (1.0 - attention_mask.astype(jnp.float32)) * -1e9                # (B, S)
    bias = (pos_bias[:, None, :, :]
            + neg[None, :, None, :]).reshape(N_HEADS * B, S, S)            # (H*B, S, S)
    out = run_encoder_stack(x_emb, bias, params["stacked"])                # (B*S, D)
    # TODO(synk): BaseModelOutput dataclass wrapper is metadata-only; return
    # last_hidden_states directly.
    return out.reshape(B, S, D_MODEL)


# ---------------------------------------------------------------------------
# Deterministic parameter init + layout prep (stack layers, fuse QKV, pad, bf16)
# ---------------------------------------------------------------------------
def init_params(key):
    ks = jax.random.split(key, 4 + N_LAYERS * 8)
    it = iter(ks)
    p = {
        "embedding": 0.02 * jax.random.normal(next(it), (VOCAB, D_MODEL), jnp.float32),
        "rel_table": 0.02 * jax.random.normal(next(it), (NUM_BUCKETS, N_HEADS), jnp.float32),
        "final_ln": jnp.ones((1, D_MODEL), jnp.float32),
        "layers": [],
    }
    inner = N_HEADS * D_KV
    for _ in range(N_LAYERS):
        lp = {
            "ln1": jnp.ones((1, D_MODEL), jnp.float32),
            "wq": 0.02 * jax.random.normal(next(it), (D_MODEL, inner), jnp.float32),
            "wk": 0.02 * jax.random.normal(next(it), (D_MODEL, inner), jnp.float32),
            "wv": 0.02 * jax.random.normal(next(it), (D_MODEL, inner), jnp.float32),
            "wo": 0.02 * jax.random.normal(next(it), (inner, D_MODEL), jnp.float32),
            "ln2": jnp.ones((1, D_MODEL), jnp.float32),
            "wi": 0.02 * jax.random.normal(next(it), (D_MODEL, D_FF), jnp.float32),
            "wff": 0.02 * jax.random.normal(next(it), (D_FF, D_MODEL), jnp.float32),
        }
        p["layers"].append(lp)
    return p


def prepare_params(p):
    """Stack per-layer weights on a leading layer axis, fuse QKV, zero-pad the
    fused-QKV / FFN lane dims to 128, store matmul weights bf16 (MXU operands);
    norm scales stay fp32.  Zero padding keeps numerics exact."""
    layers = p["layers"]

    def fused_qkv(lp):  # (D, 3*inner) columns = [Q | K | V], head-major inside each
        w = jnp.concatenate([lp["wq"], lp["wk"], lp["wv"]], axis=1)
        return jnp.pad(w, ((0, 0), (0, QKV_PAD - w.shape[1])))

    def pad_wi(w):      # (D, D_FF) -> (D, FF_PAD)
        return jnp.pad(w, ((0, 0), (0, FF_PAD - w.shape[1])))

    def pad_wff(w):     # (D_FF, D) -> (FF_PAD, D)
        return jnp.pad(w, ((0, FF_PAD - w.shape[0]), (0, 0)))

    return {
        "ln1":  jnp.stack([lp["ln1"] for lp in layers]),                                # (L,1,D) f32
        "wqkv": jnp.stack([fused_qkv(lp) for lp in layers]).astype(jnp.bfloat16),       # (L,D,128)
        "wo":   jnp.stack([lp["wo"] for lp in layers]).astype(jnp.bfloat16),            # (L,inner,D)
        "ln2":  jnp.stack([lp["ln2"] for lp in layers]),                                # (L,1,D) f32
        "wi":   jnp.stack([pad_wi(lp["wi"]) for lp in layers]).astype(jnp.bfloat16),    # (L,D,128)
        "wff":  jnp.stack([pad_wff(lp["wff"]) for lp in layers]).astype(jnp.bfloat16),  # (L,128,D)
        "final_ln": p["final_ln"],                                                      # (1,D) f32
    }


if __name__ == "__main__":
    B, S = 2, 8
    key = jax.random.PRNGKey(0)
    k_param, k_ids = jax.random.split(key)
    raw = init_params(k_param)
    params = {
        "embedding": raw["embedding"],
        "rel_table": raw["rel_table"],
        "stacked": prepare_params(raw),
    }

    input_ids = jax.random.randint(k_ids, (B, S), 0, VOCAB, dtype=jnp.int32)
    attention_mask = jnp.ones((B, S), jnp.float32)

    fwd = jax.jit(t5_encoder_forward)
    last_hidden_states = fwd(input_ids, attention_mask, params)
    jax.block_until_ready(last_hidden_states)
    assert last_hidden_states.shape == (B, S, D_MODEL)
    assert bool(jnp.all(jnp.isfinite(last_hidden_states)))
    print("KERNEL_OK")
</pallas_src>

<mosaic_0001>
module attributes {stable_mosaic.version = 11 : i64} {
  func.func @t5_encoder_kernel(%arg0: memref<16x32xf32, #tpu.memory_space<vmem>>, %arg1: memref<8x8x8xf32, #tpu.memory_space<vmem>>, %arg2: memref<2x1x32xf32, #tpu.memory_space<vmem>>, %arg3: memref<2x32x128xbf16, #tpu.memory_space<vmem>>, %arg4: memref<2x32x32xbf16, #tpu.memory_space<vmem>>, %arg5: memref<2x1x32xf32, #tpu.memory_space<vmem>>, %arg6: memref<2x32x128xbf16, #tpu.memory_space<vmem>>, %arg7: memref<2x128x32xbf16, #tpu.memory_space<vmem>>, %arg8: memref<1x32xf32, #tpu.memory_space<vmem>>, %arg9: memref<16x32xf32, #tpu.memory_space<vmem>>) attributes {dimension_semantics = [], scalar_prefetch = 0 : i64, scratch_operands = 0 : i64, tpu.core_type = #tpu.core_type<tc>} {
    %c0 = arith.constant 0 : index
    %c0_0 = arith.constant 0 : index
    %c0_1 = arith.constant 0 : index
    %0 = vector.load %arg1[%c0, %c0_0, %c0_1] : memref<8x8x8xf32, #tpu.memory_space<vmem>>, vector<8x8x8xf32>
    %c0_2 = arith.constant 0 : index
    %c0_3 = arith.constant 0 : index
    %1 = vector.load %arg0[%c0_2, %c0_3] : memref<16x32xf32, #tpu.memory_space<vmem>>, vector<16x32xf32>
    %c0_4 = arith.constant 0 : index
    %c0_5 = arith.constant 0 : index
    %c0_6 = arith.constant 0 : index
    %2 = vector.load %arg2[%c0_4, %c0_5, %c0_6] : memref<2x1x32xf32, #tpu.memory_space<vmem>>, vector<1x1x32xf32>
    %3 = vector.shape_cast %2 : vector<1x1x32xf32> to vector<1x32xf32>
    %4 = arith.mulf %1, %1 : vector<16x32xf32>
    %cst = arith.constant dense<0.000000e+00> : vector<16xf32>
    %5 = vector.multi_reduction <add>, %4, %cst [1] : vector<16x32xf32> to vector<16xf32>
    %6 = vector.shape_cast %5 : vector<16xf32> to vector<16x1xf32>
    %cst_7 = arith.constant 3.200000e+01 : f32
    %7 = vector.broadcast %cst_7 : f32 to vector<16x1xf32>
    %8 = arith.divf %6, %7 : vector<16x1xf32>
    %cst_8 = arith.constant 9.99999997E-7 : f32
    %9 = vector.broadcast %cst_8 : f32 to vector<16x1xf32>
    %10 = arith.addf %8, %9 : vector<16x1xf32>
    %11 = math.rsqrt %10 : vector<16x1xf32>
    %12 = vector.broadcast %11 : vector<16x1xf32> to vector<16x32xf32>
    %13 = arith.mulf %1, %12 : vector<16x32xf32>
    %14 = vector.broadcast %3 : vector<1x32xf32> to vector<16x32xf32>
    %15 = arith.mulf %13, %14 : vector<16x32xf32>
    %16 = arith.truncf %15 : vector<16x32xf32> to vector<16x32xbf16>
    %c0_9 = arith.constant 0 : index
    %c0_10 = arith.constant 0 : index
    %c0_11 = arith.constant 0 : index
    %17 = vector.load %arg3[%c0_9, %c0_10, %c0_11] : memref<2x32x128xbf16, #tpu.memory_space<vmem>>, vector<1x32x128xbf16>
    %18 = vector.shape_cast %17 : vector<1x32x128xbf16> to vector<32x128xbf16>
    %cst_12 = arith.constant dense<0.000000e+00> : vector<16x128xf32>
    %19 = tpu.matmul %16, %18, %cst_12 {dimension_numbers = #tpu.dot_dimension_numbers<[1], [0], [0], [1], [0, 0, 1, 1], [], []>} : vector<16x32xbf16>, vector<32x128xbf16>, vector<16x128xf32> -> vector<16x128xf32>
    %20 = vector.extract_strided_slice %19 {offsets = [0, 0], sizes = [16, 32], strides = [1, 1]} : vector<16x128xf32> to vector<16x32xf32>
    %21 = vector.extract_strided_slice %20 {offsets = [0, 0], sizes = [16, 8], strides = [1, 1]} : vector<16x32xf32> to vector<16x8xf32>
    %22 = vector.extract_strided_slice %20 {offsets = [0, 8], sizes = [16, 8], strides = [1, 1]} : vector<16x32xf32> to vector<16x8xf32>
    %23 = vector.extract_strided_slice %20 {offsets = [0, 16], sizes = [16, 8], strides = [1, 1]} : vector<16x32xf32> to vector<16x8xf32>
    %24 = vector.extract_strided_slice %20 {offsets = [0, 24], sizes = [16, 8], strides = [1, 1]} : vector<16x32xf32> to vector<16x8xf32>
    %25 = vector.shape_cast %21 : vector<16x8xf32> to vector<1x16x8xf32>
    %26 = vector.shape_cast %22 : vector<16x8xf32> to vector<1x16x8xf32>
    %27 = vector.shape_cast %23 : vector<16x8xf32> to vector<1x16x8xf32>
    %28 = vector.shape_cast %24 : vector<16x8xf32> to vector<1x16x8xf32>
    %29 = tpu.concatenate %25, %26, %27, %28 in 0 : vector<1x16x8xf32>, vector<1x16x8xf32>, vector<1x16x8xf32>, vector<1x16x8xf32> -> vector<4x16x8xf32>
    %30 = vector.shape_cast %29 : vector<4x16x8xf32> to vector<8x8x8xf32>
    %31 = arith.truncf %30 : vector<8x8x8xf32> to vector<8x8x8xbf16>
    %32 = vector.extract_strided_slice %19 {offsets = [0, 32], sizes = [16, 32], strides = [1, 1]} : vector<16x128xf32> to vector<16x32xf32>
    %33 = vector.extract_strided_slice %32 {offsets = [0, 0], sizes = [16, 8], strides = [1, 1]} : vector<16x32xf32> to vector<16x8xf32>
    %34 = vector.extract_strided_slice %32 {offsets = [0, 8], sizes = [16, 8], strides = [1, 1]} : vector<16x32xf32> to vector<16x8xf32>
    %35 = vector.extract_strided_slice %32 {offsets = [0, 16], sizes = [16, 8], strides = [1, 1]} : vector<16x32xf32> to vector<16x8xf32>
    %36 = vector.extract_strided_slice %32 {offsets = [0, 24], sizes = [16, 8], strides = [1, 1]} : vector<16x32xf32> to vector<16x8xf32>
    %37 = vector.shape_cast %33 : vector<16x8xf32> to vector<1x16x8xf32>
    %38 = vector.shape_cast %34 : vector<16x8xf32> to vector<1x16x8xf32>
    %39 = vector.shape_cast %35 : vector<16x8xf32> to vector<1x16x8xf32>
    %40 = vector.shape_cast %36 : vector<16x8xf32> to vector<1x16x8xf32>
    %41 = tpu.concatenate %37, %38, %39, %40 in 0 : vector<1x16x8xf32>, vector<1x16x8xf32>, vector<1x16x8xf32>, vector<1x16x8xf32> -> vector<4x16x8xf32>
    %42 = vector.shape_cast %41 : vector<4x16x8xf32> to vector<8x8x8xf32>
    %43 = arith.truncf %42 : vector<8x8x8xf32> to vector<8x8x8xbf16>
    %44 = vector.extract_strided_slice %19 {offsets = [0, 64], sizes = [16, 32], strides = [1, 1]} : vector<16x128xf32> to vector<16x32xf32>
    %45 = vector.extract_strided_slice %44 {offsets = [0, 0], sizes = [16, 8], strides = [1, 1]} : vector<16x32xf32> to vector<16x8xf32>
    %46 = vector.extract_strided_slice %44 {offsets = [0, 8], sizes = [16, 8], strides = [1, 1]} : vector<16x32xf32> to vector<16x8xf32>
    %47 = vector.extract_strided_slice %44 {offsets = [0, 16], sizes = [16, 8], strides = [1, 1]} : vector<16x32xf32> to vector<16x8xf32>
    %48 = vector.extract_strided_slice %44 {offsets = [0, 24], sizes = [16, 8], strides = [1, 1]} : vector<16x32xf32> to vector<16x8xf32>
    %49 = vector.shape_cast %45 : vector<16x8xf32> to vector<1x16x8xf32>
    %50 = vector.shape_cast %46 : vector<16x8xf32> to vector<1x16x8xf32>
    %51 = vector.shape_cast %47 : vector<16x8xf32> to vector<1x16x8xf32>
    %52 = vector.shape_cast %48 : vector<16x8xf32> to vector<1x16x8xf32>
    %53 = tpu.concatenate %49, %50, %51, %52 in 0 : vector<1x16x8xf32>, vector<1x16x8xf32>, vector<1x16x8xf32>, vector<1x16x8xf32> -> vector<4x16x8xf32>
    %54 = vector.shape_cast %53 : vector<4x16x8xf32> to vector<8x8x8xf32>
    %55 = arith.truncf %54 : vector<8x8x8xf32> to vector<8x8x8xbf16>
    "tpu.trace_start"() <{level = 10 : i32, message = "xqd,xkd->xqk"}> : () -> ()
    %cst_13 = arith.constant dense<0.000000e+00> : vector<8x8x8xf32>
    %56 = tpu.matmul %31, %43, %cst_13 {dimension_numbers = #tpu.dot_dimension_numbers<[2], [2], [1], [1], [0, 0, 0, 1, 1, 1], [0], [0]>} : vector<8x8x8xbf16>, vector<8x8x8xbf16>, vector<8x8x8xf32> -> vector<8x8x8xf32>
    "tpu.trace_stop"() : () -> ()
    %57 = arith.addf %56, %0 : vector<8x8x8xf32>
    %cst_14 = arith.constant dense<0xFF800000> : vector<8x8xf32>
    %58 = vector.multi_reduction <maximumf>, %57, %cst_14 [2] : vector<8x8x8xf32> to vector<8x8xf32>
    %59 = vector.shape_cast %58 : vector<8x8xf32> to vector<8x8x1xf32>
    %60 = vector.broadcast %59 : vector<8x8x1xf32> to vector<8x8x8xf32>
    %61 = arith.subf %57, %60 : vector<8x8x8xf32>
    %62 = math.exp %61 : vector<8x8x8xf32>
    %cst_15 = arith.constant dense<0.000000e+00> : vector<8x8xf32>
    %63 = vector.multi_reduction <add>, %62, %cst_15 [2] : vector<8x8x8xf32> to vector<8x8xf32>
    %64 = vector.shape_cast %63 : vector<8x8xf32> to vector<8x8x1xf32>
    %65 = tpu.reciprocal %64 {approx = true} : vector<8x8x1xf32> -> vector<8x8x1xf32>
    %66 = vector.broadcast %65 : vector<8x8x1xf32> to vector<8x8x8xf32>
    %67 = arith.mulf %62, %66 : vector<8x8x8xf32>
    %68 = arith.truncf %67 : vector<8x8x8xf32> to vector<8x8x8xbf16>
    "tpu.trace_start"() <{level = 10 : i32, message = "xqk,xkd->xqd"}> : () -> ()
    %cst_16 = arith.constant dense<0.000000e+00> : vector<8x8x8xf32>
    %69 = tpu.matmul %68, %55, %cst_16 {dimension_numbers = #tpu.dot_dimension_numbers<[2], [1], [1], [2], [0, 0, 0, 1, 1, 2], [0], [0]>} : vector<8x8x8xbf16>, vector<8x8x8xbf16>, vector<8x8x8xf32> -> vector<8x8x8xf32>
    "tpu.trace_stop"() : () -> ()
    %70 = vector.shape_cast %69 : vector<8x8x8xf32> to vector<4x16x8xf32>
    %71 = vector.extract_strided_slice %70 {offsets = [0, 0, 0], sizes = [1, 16, 8], strides = [1, 1, 1]} : vector<4x16x8xf32> to vector<1x16x8xf32>
    %72 = vector.shape_cast %71 : vector<1x16x8xf32> to vector<16x8xf32>
    %73 = vector.extract_strided_slice %70 {offsets = [1, 0, 0], sizes = [1, 16, 8], strides = [1, 1, 1]} : vector<4x16x8xf32> to vector<1x16x8xf32>
    %74 = vector.shape_cast %73 : vector<1x16x8xf32> to vector<16x8xf32>
    %75 = vector.extract_strided_slice %70 {offsets = [2, 0, 0], sizes = [1, 16, 8], strides = [1, 1, 1]} : vector<4x16x8xf32> to vector<1x16x8xf32>
    %76 = vector.shape_cast %75 : vector<1x16x8xf32> to vector<16x8xf32>
    %77 = vector.extract_strided_slice %70 {offsets = [3, 0, 0], sizes = [1, 16, 8], strides = [1, 1, 1]} : vector<4x16x8xf32> to vector<1x16x8xf32>
    %78 = vector.shape_cast %77 : vector<1x16x8xf32> to vector<16x8xf32>
    %79 = tpu.concatenate %72, %74, %76, %78 in 1 : vector<16x8xf32>, vector<16x8xf32>, vector<16x8xf32>, vector<16x8xf32> -> vector<16x32xf32>
    %80 = arith.truncf %79 : vector<16x32xf32> to vector<16x32xbf16>
    %c0_17 = arith.constant 0 : index
    %c0_18 = arith.constant 0 : index
    %c0_19 = arith.constant 0 : index
    %81 = vector.load %arg4[%c0_17, %c0_18, %c0_19] : memref<2x32x32xbf16, #tpu.memory_space<vmem>>, vector<1x32x32xbf16>
    %82 = vector.shape_cast %81 : vector<1x32x32xbf16> to vector<32x32xbf16>
    %cst_20 = arith.constant dense<0.000000e+00> : vector<16x32xf32>
    %83 = tpu.matmul %80, %82, %cst_20 {dimension_numbers = #tpu.dot_dimension_numbers<[1], [0], [0], [1], [0, 0, 1, 1], [], []>} : vector<16x32xbf16>, vector<32x32xbf16>, vector<16x32xf32> -> vector<16x32xf32>
    %84 = arith.addf %1, %83 : vector<16x32xf32>
    %c0_21 = arith.constant 0 : index
    %c0_22 = arith.constant 0 : index
    %c0_23 = arith.constant 0 : index
    %85 = vector.load %arg5[%c0_21, %c0_22, %c0_23] : memref<2x1x32xf32, #tpu.memory_space<vmem>>, vector<1x1x32xf32>
    %86 = vector.shape_cast %85 : vector<1x1x32xf32> to vector<1x32xf32>
    %87 = arith.mulf %84, %84 : vector<16x32xf32>
    %cst_24 = arith.constant dense<0.000000e+00> : vector<16xf32>
    %88 = vector.multi_reduction <add>, %87, %cst_24 [1] : vector<16x32xf32> to vector<16xf32>
    %89 = vector.shape_cast %88 : vector<16xf32> to vector<16x1xf32>
    %cst_25 = arith.constant 3.200000e+01 : f32
    %90 = vector.broadcast %cst_25 : f32 to vector<16x1xf32>
    %91 = arith.divf %89, %90 : vector<16x1xf32>
    %cst_26 = arith.constant 9.99999997E-7 : f32
    %92 = vector.broadcast %cst_26 : f32 to vector<16x1xf32>
    %93 = arith.addf %91, %92 : vector<16x1xf32>
    %94 = math.rsqrt %93 : vector<16x1xf32>
    %95 = vector.broadcast %94 : vector<16x1xf32> to vector<16x32xf32>
    %96 = arith.mulf %84, %95 : vector<16x32xf32>
    %97 = vector.broadcast %86 : vector<1x32xf32> to vector<16x32xf32>
    %98 = arith.mulf %96, %97 : vector<16x32xf32>
    %99 = arith.truncf %98 : vector<16x32xf32> to vector<16x32xbf16>
    %c0_27 = arith.constant 0 : index
    %c0_28 = arith.constant 0 : index
    %c0_29 = arith.constant 0 : index
    %100 = vector.load %arg6[%c0_27, %c0_28, %c0_29] : memref<2x32x128xbf16, #tpu.memory_space<vmem>>, vector<1x32x128xbf16>
    %101 = vector.shape_cast %100 : vector<1x32x128xbf16> to vector<32x128xbf16>
    %cst_30 = arith.constant dense<0.000000e+00> : vector<16x128xf32>
    %102 = tpu.matmul %99, %101, %cst_30 {dimension_numbers = #tpu.dot_dimension_numbers<[1], [0], [0], [1], [0, 0, 1, 1], [], []>} : vector<16x32xbf16>, vector<32x128xbf16>, vector<16x128xf32> -> vector<16x128xf32>
    %cst_31 = arith.constant 0.000000e+00 : f32
    %103 = vector.broadcast %cst_31 : f32 to vector<16x128xf32>
    %104 = arith.maximumf %102, %103 : vector<16x128xf32>
    %105 = arith.truncf %104 : vector<16x128xf32> to vector<16x128xbf16>
    %c0_32 = arith.constant 0 : index
    %c0_33 = arith.constant 0 : index
    %c0_34 = arith.constant 0 : index
    %106 = vector.load %arg7[%c0_32, %c0_33, %c0_34] : memref<2x128x32xbf16, #tpu.memory_space<vmem>>, vector<1x128x32xbf16>
    %107 = vector.shape_cast %106 : vector<1x128x32xbf16> to vector<128x32xbf16>
    %cst_35 = arith.constant dense<0.000000e+00> : vector<16x32xf32>
    %108 = tpu.matmul %105, %107, %cst_35 {dimension_numbers = #tpu.dot_dimension_numbers<[1], [0], [0], [1], [0, 0, 1, 1], [], []>} : vector<16x128xbf16>, vector<128x32xbf16>, vector<16x32xf32> -> vector<16x32xf32>
    %109 = arith.addf %84, %108 : vector<16x32xf32>
    %c1 = arith.constant 1 : index
    %c0_36 = arith.constant 0 : index
    %c0_37 = arith.constant 0 : index
    %110 = vector.load %arg2[%c1, %c0_36, %c0_37] : memref<2x1x32xf32, #tpu.memory_space<vmem>>, vector<1x1x32xf32>
    %111 = vector.shape_cast %110 : vector<1x1x32xf32> to vector<1x32xf32>
    %112 = arith.mulf %109, %109 : vector<16x32xf32>
    %cst_38 = arith.constant dense<0.000000e+00> : vector<16xf32>
    %113 = vector.multi_reduction <add>, %112, %cst_38 [1] : vector<16x32xf32> to vector<16xf32>
    %114 = vector.shape_cast %113 : vector<16xf32> to vector<16x1xf32>
    %cst_39 = arith.constant 3.200000e+01 : f32
    %115 = vector.broadcast %cst_39 : f32 to vector<16x1xf32>
    %116 = arith.divf %114, %115 : vector<16x1xf32>
    %cst_40 = arith.constant 9.99999997E-7 : f32
    %117 = vector.broadcast %cst_40 : f32 to vector<16x1xf32>
    %118 = arith.addf %116, %117 : vector<16x1xf32>
    %119 = math.rsqrt %118 : vector<16x1xf32>
    %120 = vector.broadcast %119 : vector<16x1xf32> to vector<16x32xf32>
    %121 = arith.mulf %109, %120 : vector<16x32xf32>
    %122 = vector.broadcast %111 : vector<1x32xf32> to vector<16x32xf32>
    %123 = arith.mulf %121, %122 : vector<16x32xf32>
    %124 = arith.truncf %123 : vector<16x32xf32> to vector<16x32xbf16>
    %c1_41 = arith.constant 1 : index
    %c0_42 = arith.constant 0 : index
    %c0_43 = arith.constant 0 : index
    %125 = vector.load %arg3[%c1_41, %c0_42, %c0_43] : memref<2x32x128xbf16, #tpu.memory_space<vmem>>, vector<1x32x128xbf16>
    %126 = vector.shape_cast %125 : vector<1x32x128xbf16> to vector<32x128xbf16>
    %cst_44 = arith.constant dense<0.000000e+00> : vector<16x128xf32>
    %127 = tpu.matmul %124, %126, %cst_44 {dimension_numbers = #tpu.dot_dimension_numbers<[1], [0], [0], [1], [0, 0, 1, 1], [], []>} : vector<16x32xbf16>, vector<32x128xbf16>, vector<16x128xf32> -> vector<16x128xf32>
    %128 = vector.extract_strided_slice %127 {offsets = [0, 0], sizes = [16, 32], strides = [1, 1]} : vector<16x128xf32> to vector<16x32xf32>
    %129 = vector.extract_strided_slice %128 {offsets = [0, 0], sizes = [16, 8], strides = [1, 1]} : vector<16x32xf32> to vector<16x8xf32>
    %130 = vector.extract_strided_slice %128 {offsets = [0, 8], sizes = [16, 8], strides = [1, 1]} : vector<16x32xf32> to vector<16x8xf32>
    %131 = vector.extract_strided_slice %128 {offsets = [0, 16], sizes = [16, 8], strides = [1, 1]} : vector<16x32xf32> to vector<16x8xf32>
    %132 = vector.extract_strided_slice %128 {offsets = [0, 24], sizes = [16, 8], strides = [1, 1]} : vector<16x32xf32> to vector<16x8xf32>
    %133 = vector.shape_cast %129 : vector<16x8xf32> to vector<1x16x8xf32>
    %134 = vector.shape_cast %130 : vector<16x8xf32> to vector<1x16x8xf32>
    %135 = vector.shape_cast %131 : vector<16x8xf32> to vector<1x16x8xf32>
    %136 = vector.shape_cast %132 : vector<16x8xf32> to vector<1x16x8xf32>
    %137 = tpu.concatenate %133, %134, %135, %136 in 0 : vector<1x16x8xf32>, vector<1x16x8xf32>, vector<1x16x8xf32>, vector<1x16x8xf32> -> vector<4x16x8xf32>
    %138 = vector.shape_cast %137 : vector<4x16x8xf32> to vector<8x8x8xf32>
    %139 = arith.truncf %138 : vector<8x8x8xf32> to vector<8x8x8xbf16>
    %140 = vector.extract_strided_slice %127 {offsets = [0, 32], sizes = [16, 32], strides = [1, 1]} : vector<16x128xf32> to vector<16x32xf32>
    %141 = vector.extract_strided_slice %140 {offsets = [0, 0], sizes = [16, 8], strides = [1, 1]} : vector<16x32xf32> to vector<16x8xf32>
    %142 = vector.extract_strided_slice %140 {offsets = [0, 8], sizes = [16, 8], strides = [1, 1]} : vector<16x32xf32> to vector<16x8xf32>
    %143 = vector.extract_strided_slice %140 {offsets = [0, 16], sizes = [16, 8], strides = [1, 1]} : vector<16x32xf32> to vector<16x8xf32>
    %144 = vector.extract_strided_slice %140 {offsets = [0, 24], sizes = [16, 8], strides = [1, 1]} : vector<16x32xf32> to vector<16x8xf32>
    %145 = vector.shape_cast %141 : vector<16x8xf32> to vector<1x16x8xf32>
    %146 = vector.shape_cast %142 : vector<16x8xf32> to vector<1x16x8xf32>
    %147 = vector.shape_cast %143 : vector<16x8xf32> to vector<1x16x8xf32>
    %148 = vector.shape_cast %144 : vector<16x8xf32> to vector<1x16x8xf32>
    %149 = tpu.concatenate %145, %146, %147, %148 in 0 : vector<1x16x8xf32>, vector<1x16x8xf32>, vector<1x16x8xf32>, vector<1x16x8xf32> -> vector<4x16x8xf32>
    %150 = vector.shape_cast %149 : vector<4x16x8xf32> to vector<8x8x8xf32>
    %151 = arith.truncf %150 : vector<8x8x8xf32> to vector<8x8x8xbf16>
    %152 = vector.extract_strided_slice %127 {offsets = [0, 64], sizes = [16, 32], strides = [1, 1]} : vector<16x128xf32> to vector<16x32xf32>
    %153 = vector.extract_strided_slice %152 {offsets = [0, 0], sizes = [16, 8], strides = [1, 1]} : vector<16x32xf32> to vector<16x8xf32>
    %154 = vector.extract_strided_slice %152 {offsets = [0, 8], sizes = [16, 8], strides = [1, 1]} : vector<16x32xf32> to vector<16x8xf32>
    %155 = vector.extract_strided_slice %152 {offsets = [0, 16], sizes = [16, 8], strides = [1, 1]} : vector<16x32xf32> to vector<16x8xf32>
    %156 = vector.extract_strided_slice %152 {offsets = [0, 24], sizes = [16, 8], strides = [1, 1]} : vector<16x32xf32> to vector<16x8xf32>
    %157 = vector.shape_cast %153 : vector<16x8xf32> to vector<1x16x8xf32>
    %158 = vector.shape_cast %154 : vector<16x8xf32> to vector<1x16x8xf32>
    %159 = vector.shape_cast %155 : vector<16x8xf32> to vector<1x16x8xf32>
    %160 = vector.shape_cast %156 : vector<16x8xf32> to vector<1x16x8xf32>
    %161 = tpu.concatenate %157, %158, %159, %160 in 0 : vector<1x16x8xf32>, vector<1x16x8xf32>, vector<1x16x8xf32>, vector<1x16x8xf32> -> vector<4x16x8xf32>
    %162 = vector.shape_cast %161 : vector<4x16x8xf32> to vector<8x8x8xf32>
    %163 = arith.truncf %162 : vector<8x8x8xf32> to vector<8x8x8xbf16>
    "tpu.trace_start"() <{level = 10 : i32, message = "xqd,xkd->xqk"}> : () -> ()
    %cst_45 = arith.constant dense<0.000000e+00> : vector<8x8x8xf32>
    %164 = tpu.matmul %139, %151, %cst_45 {dimension_numbers = #tpu.dot_dimension_numbers<[2], [2], [1], [1], [0, 0, 0, 1, 1, 1], [0], [0]>} : vector<8x8x8xbf16>, vector<8x8x8xbf16>, vector<8x8x8xf32> -> vector<8x8x8xf32>
    "tpu.trace_stop"() : () -> ()
    %165 = arith.addf %164, %0 : vector<8x8x8xf32>
    %cst_46 = arith.constant dense<0xFF800000> : vector<8x8xf32>
    %166 = vector.multi_reduction <maximumf>, %165, %cst_46 [2] : vector<8x8x8xf32> to vector<8x8xf32>
    %167 = vector.shape_cast %166 : vector<8x8xf32> to vector<8x8x1xf32>
    %168 = vector.broadcast %167 : vector<8x8x1xf32> to vector<8x8x8xf32>
    %169 = arith.subf %165, %168 : vector<8x8x8xf32>
    %170 = math.exp %169 : vector<8x8x8xf32>
    %cst_47 = arith.constant dense<0.000000e+00> : vector<8x8xf32>
    %171 = vector.multi_reduction <add>, %170, %cst_47 [2] : vector<8x8x8xf32> to vector<8x8xf32>
    %172 = vector.shape_cast %171 : vector<8x8xf32> to vector<8x8x1xf32>
    %173 = tpu.reciprocal %172 {approx = true} : vector<8x8x1xf32> -> vector<8x8x1xf32>
    %174 = vector.broadcast %173 : vector<8x8x1xf32> to vector<8x8x8xf32>
    %175 = arith.mulf %170, %174 : vector<8x8x8xf32>
    %176 = arith.truncf %175 : vector<8x8x8xf32> to vector<8x8x8xbf16>
    "tpu.trace_start"() <{level = 10 : i32, message = "xqk,xkd->xqd"}> : () -> ()
    %cst_48 = arith.constant dense<0.000000e+00> : vector<8x8x8xf32>
    %177 = tpu.matmul %176, %163, %cst_48 {dimension_numbers = #tpu.dot_dimension_numbers<[2], [1], [1], [2], [0, 0, 0, 1, 1, 2], [0], [0]>} : vector<8x8x8xbf16>, vector<8x8x8xbf16>, vector<8x8x8xf32> -> vector<8x8x8xf32>
    "tpu.trace_stop"() : () -> ()
    %178 = vector.shape_cast %177 : vector<8x8x8xf32> to vector<4x16x8xf32>
    %179 = vector.extract_strided_slice %178 {offsets = [0, 0, 0], sizes = [1, 16, 8], strides = [1, 1, 1]} : vector<4x16x8xf32> to vector<1x16x8xf32>
    %180 = vector.shape_cast %179 : vector<1x16x8xf32> to vector<16x8xf32>
    %181 = vector.extract_strided_slice %178 {offsets = [1, 0, 0], sizes = [1, 16, 8], strides = [1, 1, 1]} : vector<4x16x8xf32> to vector<1x16x8xf32>
    %182 = vector.shape_cast %181 : vector<1x16x8xf32> to vector<16x8xf32>
    %183 = vector.extract_strided_slice %178 {offsets = [2, 0, 0], sizes = [1, 16, 8], strides = [1, 1, 1]} : vector<4x16x8xf32> to vector<1x16x8xf32>
    %184 = vector.shape_cast %183 : vector<1x16x8xf32> to vector<16x8xf32>
    %185 = vector.extract_strided_slice %178 {offsets = [3, 0, 0], sizes = [1, 16, 8], strides = [1, 1, 1]} : vector<4x16x8xf32> to vector<1x16x8xf32>
    %186 = vector.shape_cast %185 : vector<1x16x8xf32> to vector<16x8xf32>
    %187 = tpu.concatenate %180, %182, %184, %186 in 1 : vector<16x8xf32>, vector<16x8xf32>, vector<16x8xf32>, vector<16x8xf32> -> vector<16x32xf32>
    %188 = arith.truncf %187 : vector<16x32xf32> to vector<16x32xbf16>
    %c1_49 = arith.constant 1 : index
    %c0_50 = arith.constant 0 : index
    %c0_51 = arith.constant 0 : index
    %189 = vector.load %arg4[%c1_49, %c0_50, %c0_51] : memref<2x32x32xbf16, #tpu.memory_space<vmem>>, vector<1x32x32xbf16>
    %190 = vector.shape_cast %189 : vector<1x32x32xbf16> to vector<32x32xbf16>
    %cst_52 = arith.constant dense<0.000000e+00> : vector<16x32xf32>
    %191 = tpu.matmul %188, %190, %cst_52 {dimension_numbers = #tpu.dot_dimension_numbers<[1], [0], [0], [1], [0, 0, 1, 1], [], []>} : vector<16x32xbf16>, vector<32x32xbf16>, vector<16x32xf32> -> vector<16x32xf32>
    %192 = arith.addf %109, %191 : vector<16x32xf32>
    %c1_53 = arith.constant 1 : index
    %c0_54 = arith.constant 0 : index
    %c0_55 = arith.constant 0 : index
    %193 = vector.load %arg5[%c1_53, %c0_54, %c0_55] : memref<2x1x32xf32, #tpu.memory_space<vmem>>, vector<1x1x32xf32>
    %194 = vector.shape_cast %193 : vector<1x1x32xf32> to vector<1x32xf32>
    %195 = arith.mulf %192, %192 : vector<16x32xf32>
    %cst_56 = arith.constant dense<0.000000e+00> : vector<16xf32>
    %196 = vector.multi_reduction <add>, %195, %cst_56 [1] : vector<16x32xf32> to vector<16xf32>
    %197 = vector.shape_cast %196 : vector<16xf32> to vector<16x1xf32>
    %cst_57 = arith.constant 3.200000e+01 : f32
    %198 = vector.broadcast %cst_57 : f32 to vector<16x1xf32>
    %199 = arith.divf %197, %198 : vector<16x1xf32>
    %cst_58 = arith.constant 9.99999997E-7 : f32
    %200 = vector.broadcast %cst_58 : f32 to vector<16x1xf32>
    %201 = arith.addf %199, %200 : vector<16x1xf32>
    %202 = math.rsqrt %201 : vector<16x1xf32>
    %203 = vector.broadcast %202 : vector<16x1xf32> to vector<16x32xf32>
    %204 = arith.mulf %192, %203 : vector<16x32xf32>
    %205 = vector.broadcast %194 : vector<1x32xf32> to vector<16x32xf32>
    %206 = arith.mulf %204, %205 : vector<16x32xf32>
    %207 = arith.truncf %206 : vector<16x32xf32> to vector<16x32xbf16>
    %c1_59 = arith.constant 1 : index
    %c0_60 = arith.constant 0 : index
    %c0_61 = arith.constant 0 : index
    %208 = vector.load %arg6[%c1_59, %c0_60, %c0_61] : memref<2x32x128xbf16, #tpu.memory_space<vmem>>, vector<1x32x128xbf16>
    %209 = vector.shape_cast %208 : vector<1x32x128xbf16> to vector<32x128xbf16>
    %cst_62 = arith.constant dense<0.000000e+00> : vector<16x128xf32>
    %210 = tpu.matmul %207, %209, %cst_62 {dimension_numbers = #tpu.dot_dimension_numbers<[1], [0], [0], [1], [0, 0, 1, 1], [], []>} : vector<16x32xbf16>, vector<32x128xbf16>, vector<16x128xf32> -> vector<16x128xf32>
    %cst_63 = arith.constant 0.000000e+00 : f32
    %211 = vector.broadcast %cst_63 : f32 to vector<16x128xf32>
    %212 = arith.maximumf %210, %211 : vector<16x128xf32>
    %213 = arith.truncf %212 : vector<16x128xf32> to vector<16x128xbf16>
    %c1_64 = arith.constant 1 : index
    %c0_65 = arith.constant 0 : index
    %c0_66 = arith.constant 0 : index
    %214 = vector.load %arg7[%c1_64, %c0_65, %c0_66] : memref<2x128x32xbf16, #tpu.memory_space<vmem>>, vector<1x128x32xbf16>
    %215 = vector.shape_cast %214 : vector<1x128x32xbf16> to vector<128x32xbf16>
    %cst_67 = arith.constant dense<0.000000e+00> : vector<16x32xf32>
    %216 = tpu.matmul %213, %215, %cst_67 {dimension_numbers = #tpu.dot_dimension_numbers<[1], [0], [0], [1], [0, 0, 1, 1], [], []>} : vector<16x128xbf16>, vector<128x32xbf16>, vector<16x32xf32> -> vector<16x32xf32>
    %217 = arith.addf %192, %216 : vector<16x32xf32>
    %c0_68 = arith.constant 0 : index
    %c0_69 = arith.constant 0 : index
    %218 = vector.load %arg8[%c0_68, %c0_69] : memref<1x32xf32, #tpu.memory_space<vmem>>, vector<1x32xf32>
    %219 = arith.mulf %217, %217 : vector<16x32xf32>
    %cst_70 = arith.constant dense<0.000000e+00> : vector<16xf32>
    %220 = vector.multi_reduction <add>, %219, %cst_70 [1] : vector<16x32xf32> to vector<16xf32>
    %221 = vector.shape_cast %220 : vector<16xf32> to vector<16x1xf32>
    %cst_71 = arith.constant 3.200000e+01 : f32
    %222 = vector.broadcast %cst_71 : f32 to vector<16x1xf32>
    %223 = arith.divf %221, %222 : vector<16x1xf32>
    %cst_72 = arith.constant 9.99999997E-7 : f32
    %224 = vector.broadcast %cst_72 : f32 to vector<16x1xf32>
    %225 = arith.addf %223, %224 : vector<16x1xf32>
    %226 = math.rsqrt %225 : vector<16x1xf32>
    %227 = vector.broadcast %226 : vector<16x1xf32> to vector<16x32xf32>
    %228 = arith.mulf %217, %227 : vector<16x32xf32>
    %229 = vector.broadcast %218 : vector<1x32xf32> to vector<16x32xf32>
    %230 = arith.mulf %228, %229 : vector<16x32xf32>
    %c0_73 = arith.constant 0 : index
    %c0_74 = arith.constant 0 : index
    %231 = vector.load %arg9[%c0_73, %c0_74] : memref<16x32xf32, #tpu.memory_space<vmem>>, vector<16x32xf32>
    tpu.vector_store %arg9[%c0_73, %c0_74], %230 {strides = array<i32>} : memref<16x32xf32, #tpu.memory_space<vmem>>, vector<16x32xf32>,
    return
  }
}

</mosaic_0001>

<bundles_post_ra>
// kernel: t5_encoder_forward.1
= control target key start
LH: loop header
LB: loop body
LE: loop exit
PB: predicated region body
PF: predicated region fallthrough
CT: control target
= control target key end

     0   :  { %vm47_vm0 = vcmask 261120   ;;  %s4071_s0 = inlined_call_operand.vmem [shape: f32[16,32], index: 0, kind: input, shape index: {}]   ;;  %s4072_s1 = inlined_call_operand.vmem [shape: f32[8,8,8], index: 1, kind: input, shape index: {}]   ;;  %s4073_s2 = inlined_call_operand.vmem [shape: f32[2,1,32], index: 2, kind: input, shape index: {}]   ;;  %s4074_s3 = inlined_call_operand.vmem [shape: bf16[2,32,128], index: 3, kind: input, shape index: {}]   ;;  %s4075_s4 = inlined_call_operand.vmem [shape: bf16[2,32,32], index: 4, kind: input, shape index: {}]   ;;  %s4076_s5 = inlined_call_operand.vmem [shape: f32[2,1,32], index: 5, kind: input, shape index: {}]   ;;  %s4077_s6 = inlined_call_operand.vmem [shape: bf16[2,32,128], index: 6, kind: input, shape index: {}]   ;;  %s4078_s7 = inlined_call_operand.vmem [shape: bf16[2,128,32], index: 7, kind: input, shape index: {}]   ;;  %s4079_s8 = inlined_call_operand.vmem [shape: f32[1,32], index: 8, kind: input, shape index: {}]   ;;  %s4080_s9 = inlined_call_operand.hbm [shape: f32[16,32], index: 9, kind: output, shape index: {}]  }
   0x1   :  { %v3401_v0 = vld [vmem:[%s4071_s0] sm:$0xff]  ;;  %v3406_v1 = vld [vmem:[%s4071_s0 + $0x8] sm:$0xff] }
   0x2   :  { %v45_v2 = vmul.f32 %v3401_v0, %v3401_v0  ;;  %v46_v3 = vmul.f32 %v3406_v1, %v3406_v1 }
   0x4   :  { %v48_v4 = vsel %vm47_vm0, %v45_v2, 0.0  ;;  %v51_v5 = vsel %vm47_vm0, %v46_v3, 0.0 }
   0x5   :  { %49 = vadd.xlane.f32.xlu0 %v48_v4 }
   0x9   :  { %52 = vadd.xlane.f32.xlu0 %v51_v5 }
   0xa   :  { %14 = vsyncpa [#allocation3], 0  ;;  %v3202_v6 = vld [vmem:[%s4074_s3 + $0x8] sm:$0xff]   ;;  %v3336_v7 = vmov 0.0   ;;  %vm3337_vm1 = vmmov 0   ;;  %v3203_v8 = vld [vmem:[%s4074_s3] sm:$0xff]  }
   0xb   :  { %2850 = vmatprep.subr.bf16.mxu1 %v3336_v7  ;;  %2854 = vmatprep.mubr.msk.bf16.mxu1 %vm3337_vm1, %v3336_v7  ;;  %v2649_v18 = vld [vmem:[%s4073_s2] ss:$0 sm:$0xff]  ;;  %s3338_s18 = smov 104   ;;  %s3339_s19 = smov 120   ;;  %vm163_vm2 = vcmask 64512   ;;  %vm654_vm3 = vcmask 1043456  }
   0xc   :  { %2851 = vmatpush3.bf16.msra.mxu1 %v3202_v6  ;;  %2876 = vmatprep.subr.bf16.mxu0 %v3336_v7  ;;  %s3340_s20 = smov 112   ;;  %s3341_s21 = smov 96   ;;  %v3521_v63 = vld [vmem:[%s4072_s1] sm:$0xff]  ;;  %vm1060_vm4 = vcmask 130048   ;;  %vm1063_vm5 = vcmask 195584  }
   0xd   :  { %2852 = vmatprep.subr.bf16.mxu1 %v3336_v7  ;;  %2878 = vmatprep.mubr.msk.bf16.mxu0 %vm3337_vm1, %v3336_v7  ;;  %s3342_s22 = smov 64   ;;  %s3344_s26 = smov 16  }
   0xe   :  { %s3345_s27 = smov 24  }
  0x10   :  { %2853 = vmatpush3.bf16.msra.mxu1 %v3203_v8 }
  0x11   :  { %2858 = vmatprep.subr.bf16.mxu1 %v3336_v7 }
  0x8e   :  { %v50_v9 = vpop.xlane.xlu0 %49 }
  0x8f   :  { %v55_v10 = vmul.f32 0.03125, %v50_v9  ;;  %v3531_v9 = vld [vmem:[%s4072_s1 + $0x8] sm:$0xff] }
  0x91   :  { %v57_v11 = vadd.f32 1e-06, %v55_v10 }
  0x92   :  { %v53_v12 = vpop.xlane.xlu0 %52 }
  0x93   :  { %3230 = vrsqrt.f32 %v57_v11  ;;  %v56_v13 = vmul.f32 0.03125, %v53_v12 }
  0x95   :  { %v58_v14 = vadd.f32 1e-06, %v56_v13 }
  0x97   :  { %3232 = vrsqrt.f32 %v58_v14 }
  0xa0   :  { %v3231_v15 = vpop.eup %3230 }
  0xa1   :  { %v61_v16 = vmul.f32 %v3231_v15, %v3401_v0 }
  0xa3   :  { %v69_v20 = vmul.f32 %v2649_v18, %v61_v16  ;;  %v3538_v16 = vld [vmem:[%s4072_s1 + $0x10] sm:$0xff] }
  0xa4   :  { %v3233_v17 = vpop.eup %3232 }
  0xa5   :  { %v62_v19 = vmul.f32 %v3233_v17, %v3406_v1 }
  0xa7   :  { %v70_v21 = vmul.f32 %v2649_v18, %v62_v19 }
  0xa9   :  { %v71_v22 = vpack.c.bf16 %v70_v21, %v69_v20  ;;  %v3546_v20 = vld [vmem:[%s4072_s1 + $0x18] sm:$0xff] }
  0xab   :  { %2855 = vmatmul.mubr.msk.bf16.vlgmr.msra.gmra.mxu1 %vm47_vm0, %v71_v22 }
  0xac   :  { %2860 = vmatprep.mubr.msk.bf16.mxu1 %vm3337_vm1, %v3336_v7 }
 0x16b   :  { %v125_v23 = vpop.f32.mrf.mxu1 }
 0x16c   :  { %v152_v28 = vpack.c.bf16 %v125_v23, %v125_v23 }
 0x16d   :  { %v2856_v24 = vpop.f32.mrf.mxu1 }
 0x16f   :  { %v128_v25 = vpop.f32.mrf.mxu1 }
 0x170   :  { %v3152_v26 = vpack.i.bf16 %v128_v25, %v125_v23  ;;  %v3440_v29 = vpack.c.bf16 %v128_v25, %v128_v25 }
 0x171   :  { %v2857_v27 = vpop.f32.mrf.mxu1 }
 0x172   :  { %3153 = vrot.lane.b32.xlu0 %v3152_v26, %s3338_s18  ;;  %3143 = vrot.lane.b32.xlu1 %v3152_v26, %s3339_s19  ;;  %v3554_v27 = vld [vmem:[%s4072_s1 + $0x20] sm:$0xff] }
 0x176   :  { %3148 = vrot.lane.b32.xlu1 %v3152_v26, %s3340_s20 }
 0x17a   :  { %161 = vrot.lane.b32.xlu1 %v152_v28, %s3341_s21 }
 0x17e   :  { %211 = vrot.lane.b32.xlu1 %v3440_v29, %s3341_s21 }
 0x1e4   :  { %v3154_v30 = vpop.permute.xlu0 %3153  ;;  %v3144_v31 = vpop.permute.xlu1 %3143 }
 0x1e5   :  { %v3155_v32 = vunpack.i.l.bf16 %v3154_v30  ;;  %v3145_v33 = vunpack.i.l.bf16 %v3144_v31  ;;  %v3146_v35 = vunpack.i.h.bf16 %v3144_v31  ;;  %v3156_v45 = vunpack.i.h.bf16 %v3154_v30 }
 0x1e7   :  { %v3444_v34 = vpack.c.bf16 %v3155_v32, %v3155_v32  ;;  %v3446_v36 = vpack.c.bf16 %v3145_v33, %v3145_v33  ;;  %v3452_v38 = vpack.c.bf16 %v3146_v35, %v3146_v35  ;;  %v3470_v48 = vpack.c.bf16 %v3156_v45, %v3156_v45 }
 0x1e8   :  { %v3149_v37 = vpop.permute.xlu1 %3148 }
 0x1e9   :  { %456 = vrot.lane.b32.xlu0 %v3444_v34, %s3341_s21  ;;  %260 = vrot.lane.b32.xlu1 %v3446_v36, %s3341_s21  ;;  %v3150_v39 = vunpack.i.l.bf16 %v3149_v37  ;;  %v3151_v42 = vunpack.i.h.bf16 %v3149_v37  ;;  %v3563_v37 = vld [vmem:[%s4072_s1 + $0x28] sm:$0xff] }
 0x1eb   :  { %v3457_v43 = vpack.c.bf16 %v3150_v39, %v3150_v39  ;;  %v3462_v46 = vpack.c.bf16 %v3151_v42, %v3151_v42 }
 0x1ec   :  { %v162_v40 = vpop.permute.xlu1 %161 }
 0x1ed   :  { %v168_v41 = vsel %vm163_vm2, %v162_v40, 0  ;;  %309 = vrot.lane.b32.xlu1 %v3452_v38, %s3341_s21 }
 0x1ee   :  { %2859 = vmatpush3.bf16.xpose.msra.mxu1 %v168_v41 }
 0x1ef   :  { %2864 = vmatprep.subr.bf16.mxu1 %v3336_v7 }
 0x1f0   :  { %v212_v44 = vpop.permute.xlu1 %211 }
 0x1f1   :  { %358 = vrot.lane.b32.xlu1 %v3457_v43, %s3341_s21  ;;  %v217_v47 = vsel %vm163_vm2, %v212_v44, 0 }
 0x1f5   :  { %2861 = vmatmul.mubr.msk.bf16.vlgmr.msra.gmra.mxu1 %vm163_vm2, %v152_v28  ;;  %407 = vrot.lane.b32.xlu1 %v3462_v46, %s3341_s21 }
 0x1f6   :  { %2865 = vmatpush3.bf16.xpose.msra.mxu1 %v217_v47  ;;  %2866 = vmatprep.mubr.msk.bf16.mxu1 %vm3337_vm1, %v3336_v7  ;;  %v3573_v47 = vld [vmem:[%s4072_s1 + $0x30] sm:$0xff] }
 0x1f7   :  { %2870 = vmatprep.subr.bf16.mxu1 %v3336_v7 }
 0x1f9   :  { %505 = vrot.lane.b32.xlu1 %v3470_v48, %s3341_s21 }
 0x1fd   :  { %649 = vrot.lane.b32.xlu1 %v152_v28, %s3342_s22  ;;  %2867 = vmatmul.mubr.msk.bf16.vlgmr.msra.gmra.mxu1 %vm163_vm2, %v3440_v29 }
 0x1fe   :  { %2872 = vmatprep.mubr.msk.bf16.mxu1 %vm3337_vm1, %v3336_v7 }
 0x25b   :  { %v261_v49 = vpop.permute.xlu1 %260  ;;  %v457_v57 = vpop.permute.xlu0 %456 }
 0x25c   :  { %v266_v50 = vsel %vm163_vm2, %v261_v49, 0  ;;  %v462_v59 = vsel %vm163_vm2, %v457_v57, 0 }
 0x25d   :  { %2871 = vmatpush3.bf16.xpose.msra.mxu1 %v266_v50 }
 0x25e   :  { %2882 = vmatprep.subr.bf16.mxu1 %v3336_v7 }
 0x25f   :  { %v310_v51 = vpop.permute.xlu1 %309 }
 0x260   :  { %v315_v52 = vsel %vm163_vm2, %v310_v51, 0 }
 0x261   :  { %2877 = vmatpush3.bf16.xpose.msra.mxu0 %v315_v52 }
 0x262   :  { %2888 = vmatprep.subr.bf16.mxu0 %v3336_v7 }
 0x263   :  { %v359_v53 = vpop.permute.xlu1 %358 }
 0x264   :  { %v364_v54 = vsel %vm163_vm2, %v359_v53, 0  ;;  %2873 = vmatmul.mubr.msk.bf16.vlgmr.msra.gmra.mxu1 %vm163_vm2, %v3446_v36 }
 0x265   :  { %2883 = vmatpush3.bf16.xpose.msra.mxu1 %v364_v54  ;;  %2884 = vmatprep.mubr.msk.bf16.mxu1 %vm3337_vm1, %v3336_v7 }
 0x266   :  { %2894 = vmatprep.subr.bf16.mxu1 %v3336_v7 }
 0x267   :  { %v408_v55 = vpop.permute.xlu1 %407 }
 0x268   :  { %v413_v56 = vsel %vm163_vm2, %v408_v55, 0  ;;  %2879 = vmatmul.mubr.msk.bf16.vlgmr.msra.gmra.mxu0 %vm163_vm2, %v3452_v38  ;;  %v3581_v55 = vld [vmem:[%s4072_s1 + $0x38] sm:$0xff]  ;;  %s3343_s1 = smov 8  }
 0x269   :  { %2889 = vmatpush3.bf16.xpose.msra.mxu0 %v413_v56  ;;  %2890 = vmatprep.mubr.msk.bf16.mxu0 %vm3337_vm1, %v3336_v7 }
 0x26a   :  { %2900 = vmatprep.subr.bf16.mxu0 %v3336_v7 }
 0x26b   :  { %v506_v58 = vpop.permute.xlu1 %505 }
 0x26c   :  { %2885 = vmatmul.mubr.msk.bf16.vlgmr.msra.gmra.mxu1 %vm163_vm2, %v3457_v43  ;;  %v511_v60 = vsel %vm163_vm2, %v506_v58, 0 }
 0x26d   :  { %2895 = vmatpush3.bf16.xpose.msra.mxu1 %v462_v59  ;;  %2896 = vmatprep.mubr.msk.bf16.mxu1 %vm3337_vm1, %v3336_v7 }
 0x26e   :  { %2906 = vmatprep.subr.bf16.mxu1 %v3336_v7 }
 0x26f   :  { %v650_v61 = vpop.permute.xlu1 %649 }
 0x270   :  { %2891 = vmatmul.mubr.msk.bf16.vlgmr.msra.gmra.mxu0 %vm163_vm2, %v3462_v46  ;;  %v656_v62 = vsel %vm654_vm3, %v650_v61, 0 }
 0x271   :  { %2901 = vmatpush3.bf16.xpose.msra.mxu0 %v511_v60  ;;  %2902 = vmatprep.mubr.msk.bf16.mxu0 %vm3337_vm1, %v3336_v7 }
 0x272   :  { %2912 = vmatprep.subr.bf16.mxu0 %v3336_v7 }
 0x274   :  { %2897 = vmatmul.mubr.msk.bf16.vlgmr.msra.gmra.mxu1 %vm163_vm2, %v3444_v34 }
 0x275   :  { %2907 = vmatpush3.bf16.msra.mxu1 %v656_v62  ;;  %2908 = vmatprep.mubr.msk.bf16.mxu1 %vm3337_vm1, %v3336_v7 }
 0x276   :  { %2918 = vmatprep.subr.bf16.mxu1 %v3336_v7 }
 0x278   :  { %2903 = vmatmul.mubr.msk.bf16.vlgmr.msra.gmra.mxu0 %vm163_vm2, %v3470_v48 }
 0x279   :  { %2914 = vmatprep.mubr.msk.bf16.mxu0 %vm3337_vm1, %v3336_v7 }
 0x2b5   :  { %v204_v2 = vpop.f32.mrf.mxu1 }
 0x2b6   :  { %v3524_v3 = vadd.f32 %v204_v2, %v3521_v63 }
 0x2b7   :  { %v2862_v4 = vpop.f32.mrf.mxu1 }
 0x2b8   :  { %v553_v5 = vsel %vm163_vm2, %v3524_v3, -inf }
 0x2b9   :  { %v207_v6 = vpop.f32.mrf.mxu1  ;;  %554 = vmax.xlane.f32.xlu0 %v553_v5 }
 0x2bb   :  { %v2863_v8 = vpop.f32.mrf.mxu1 }
 0x2bd   :  { %v253_v10 = vpop.f32.mrf.mxu1 }
 0x2be   :  { %v254_v11 = vadd.f32 %v253_v10, %v3531_v9 }
 0x2bf   :  { %v2868_v12 = vpop.f32.mrf.mxu1 }
 0x2c0   :  { %v556_v13 = vsel %vm163_vm2, %v254_v11, -inf }
 0x2c1   :  { %v256_v14 = vpop.f32.mrf.mxu1  ;;  %557 = vmax.xlane.f32.xlu1 %v556_v13 }
 0x2c3   :  { %v2869_v15 = vpop.f32.mrf.mxu1 }
 0x324   :  { %v302_v17 = vpop.f32.mrf.mxu1 }
 0x325   :  { %v3541_v18 = vadd.f32 %v302_v17, %v3538_v16 }
 0x326   :  { %v2874_v19 = vpop.f32.mrf.mxu1 }
 0x327   :  { %v559_v21 = vsel %vm163_vm2, %v3541_v18, -inf }
 0x328   :  { %v305_v22 = vpop.f32.mrf.mxu1  ;;  %v351_v23 = vpop.f32.mrf.mxu0  ;;  %560 = vmax.xlane.f32.xlu0 %v559_v21 }
 0x329   :  { %v352_v24 = vadd.f32 %v351_v23, %v3546_v20 }
 0x32a   :  { %v2875_v25 = vpop.f32.mrf.mxu1  ;;  %v2880_v26 = vpop.f32.mrf.mxu0 }
 0x32b   :  { %v562_v28 = vsel %vm163_vm2, %v352_v24, -inf }
 0x32c   :  { %v354_v30 = vpop.f32.mrf.mxu0  ;;  %v400_v31 = vpop.f32.mrf.mxu1  ;;  %563 = vmax.xlane.f32.xlu0 %v562_v28 }
 0x32d   :  { %v3558_v32 = vadd.f32 %v400_v31, %v3554_v27 }
 0x32e   :  { %v2881_v33 = vpop.f32.mrf.mxu0  ;;  %v2886_v35 = vpop.f32.mrf.mxu1 }
 0x32f   :  { %v565_v39 = vsel %vm163_vm2, %v3558_v32, -inf }
 0x330   :  { %v403_v40 = vpop.f32.mrf.mxu1  ;;  %v449_v41 = vpop.f32.mrf.mxu0  ;;  %566 = vmax.xlane.f32.xlu1 %v565_v39 }
 0x331   :  { %v3568_v42 = vadd.f32 %v449_v41, %v3563_v37 }
 0x332   :  { %v2887_v44 = vpop.f32.mrf.mxu1  ;;  %v2892_v45 = vpop.f32.mrf.mxu0 }
 0x333   :  { %v568_v49 = vsel %vm163_vm2, %v3568_v42, -inf }
 0x334   :  { %v452_v50 = vpop.f32.mrf.mxu0  ;;  %v498_v51 = vpop.f32.mrf.mxu1  ;;  %569 = vmax.xlane.f32.xlu0 %v568_v49 }
 0x335   :  { %v499_v52 = vadd.f32 %v498_v51, %v3573_v47 }
 0x336   :  { %v2893_v53 = vpop.f32.mrf.mxu0  ;;  %v2898_v54 = vpop.f32.mrf.mxu1 }
 0x337   :  { %v571_v56 = vsel %vm163_vm2, %v499_v52, -inf }
 0x338   :  { %v501_v57 = vpop.f32.mrf.mxu1  ;;  %v547_v58 = vpop.f32.mrf.mxu0  ;;  %572 = vmax.xlane.f32.xlu1 %v571_v56 }
 0x339   :  { %v548_v59 = vadd.f32 %v547_v58, %v3581_v55 }
 0x33a   :  { %v2899_v60 = vpop.f32.mrf.mxu1  ;;  %v2904_v61 = vpop.f32.mrf.mxu0 }
 0x33b   :  { %v574_v62 = vsel %vm163_vm2, %v548_v59, -inf }
 0x33c   :  { %v550_v2 = vpop.f32.mrf.mxu0  ;;  %575 = vmax.xlane.f32.xlu0 %v574_v62 }
 0x33e   :  { %v2905_v4 = vpop.f32.mrf.mxu0 }
 0x342   :  { %v555_v5 = vpop.xlane.xlu0 %554 }
 0x343   :  { %v577_v8 = vsub.f32 %v3524_v3, %v555_v5 }
 0x345   :  { %v585_v12 = vmul.f32 1.442695, %v577_v8 }
 0x347   :  { %3234 = vpow2.f32 %v585_v12 }
 0x349   :  { %746 = vrot.lane.b32.xlu1 %v3446_v36, %s3342_s22 }
 0x34a   :  { %v558_v6 = vpop.xlane.xlu1 %557 }
 0x34b   :  { %v578_v10 = vsub.f32 %v254_v11, %v558_v6 }
 0x34d   :  { %794 = vrot.lane.b32.xlu1 %v3452_v38, %s3342_s22  ;;  %v587_v13 = vmul.f32 1.442695, %v578_v10 }
 0x34f   :  { %3236 = vpow2.f32 %v587_v13 }
 0x352   :  { %698 = vrot.lane.b32.xlu0 %v3440_v29, %s3342_s22 }
 0x354   :  { %v3235_v14 = vpop.eup %3234 }
 0x355   :  { %v601_v36 = vsel %vm163_vm2, %v3235_v14, 0.0 }
 0x35c   :  { %v3237_v15 = vpop.eup %3236 }
 0x35d   :  { %v604_v17 = vsel %vm163_vm2, %v3237_v15, 0.0 }
 0x371   :  { %605 = vadd.xlane.f32.xlu0 %v604_v17  ;;  %602 = vadd.xlane.f32.xlu1 %v601_v36 }
 0x3b1   :  { %v561_v38 = vpop.xlane.xlu0 %560 }
 0x3b2   :  { %v579_v29 = vsub.f32 %v3541_v18, %v561_v38 }
 0x3b4   :  { %v589_v19 = vmul.f32 1.442695, %v579_v29 }
 0x3b5   :  { %v564_v21 = vpop.xlane.xlu0 %563 }
 0x3b6   :  { %3238 = vpow2.f32 %v589_v19  ;;  %v580_v3 = vsub.f32 %v352_v24, %v564_v21 }
 0x3b8   :  { %v591_v11 = vmul.f32 1.442695, %v580_v3 }
 0x3b9   :  { %v567_v24 = vpop.xlane.xlu1 %566 }
 0x3ba   :  { %3240 = vpow2.f32 %v591_v11  ;;  %v581_v33 = vsub.f32 %v3558_v32, %v567_v24 }
 0x3bc   :  { %v593_v40 = vmul.f32 1.442695, %v581_v33 }
 0x3bd   :  { %v570_v22 = vpop.xlane.xlu0 %569 }
 0x3be   :  { %v582_v39 = vsub.f32 %v3568_v42, %v570_v22  ;;  %3242 = vpow2.f32 %v593_v40 }
 0x3c0   :  { %v595_v44 = vmul.f32 1.442695, %v582_v39 }
 0x3c1   :  { %v573_v35 = vpop.xlane.xlu1 %572 }
 0x3c2   :  { %v583_v41 = vsub.f32 %v499_v52, %v573_v35  ;;  %3244 = vpow2.f32 %v595_v44 }
 0x3c3   :  { %v3596_v23 = vpop.eup %3238 }
 0x3c4   :  { %v607_v25 = vsel %vm163_vm2, %v3596_v23, 0.0  ;;  %v597_v45 = vmul.f32 1.442695, %v583_v41 }
 0x3c5   :  { %608 = vadd.xlane.f32.xlu1 %v607_v25  ;;  %v576_v26 = vpop.xlane.xlu0 %575  ;;  %v747_v51 = vpop.permute.xlu1 %746 }
 0x3c6   :  { %v584_v49 = vsub.f32 %v548_v59, %v576_v26  ;;  %3246 = vpow2.f32 %v597_v45  ;;  %v752_v6 = vsel %vm654_vm3, %v747_v51, 0 }
 0x3c7   :  { %v3600_v28 = vpop.eup %3240 }
 0x3c8   :  { %v610_v30 = vsel %vm163_vm2, %v3600_v28, 0.0  ;;  %v599_v50 = vmul.f32 1.442695, %v584_v49 }
 0x3c9   :  { %611 = vadd.xlane.f32.xlu0 %v610_v30  ;;  %v699_v18 = vpop.permute.xlu0 %698  ;;  %v795_v53 = vpop.permute.xlu1 %794 }
 0x3ca   :  { %v704_v31 = vsel %vm654_vm3, %v699_v18, 0  ;;  %3248 = vpow2.f32 %v599_v50  ;;  %v800_v8 = vsel %vm654_vm3, %v795_v53, 0 }
 0x3cb   :  { %2913 = vmatpush3.bf16.msra.mxu0 %v704_v31 }
 0x3cc   :  { %2924 = vmatprep.subr.bf16.mxu0 %v3336_v7 }
 0x3d6   :  { %890 = vrot.lane.b32.xlu1 %v3462_v46, %s3342_s22  ;;  %v3612_v46 = vpop.eup %3242 }
 0x3d7   :  { %v613_v32 = vsel %vm163_vm2, %v3612_v46, 0.0 }
 0x3df   :  { %842 = vrot.lane.b32.xlu0 %v3457_v43, %s3342_s22  ;;  %v3614_v43 = vpop.eup %3244 }
 0x3e0   :  { %v3618_v42 = vpop.eup %3246  ;;  %v616_v57 = vsel %vm163_vm2, %v3614_v43, 0.0 }
 0x3e1   :  { %v619_v56 = vsel %vm163_vm2, %v3618_v42, 0.0  ;;  %v3624_v58 = vpop.eup %3248 }
 0x3e2   :  { %v622_v59 = vsel %vm163_vm2, %v3624_v58, 0.0 }
 0x3fa   :  { %v603_v52 = vpop.xlane.xlu1 %602  ;;  %614 = vadd.xlane.f32.xlu1 %v613_v32  ;;  %v606_v54 = vpop.xlane.xlu0 %605 }
 0x3fb   :  { %3250 = vrcp.f32 %v603_v52 }
 0x3fc   :  { %3252 = vrcp.f32 %v606_v54 }
 0x3fe   :  { %620 = vadd.xlane.f32.xlu1 %v619_v56  ;;  %617 = vadd.xlane.f32.xlu0 %v616_v57 }
 0x402   :  { %623 = vadd.xlane.f32.xlu0 %v622_v59 }
 0x408   :  { %v3251_v60 = vpop.eup %3250 }
 0x409   :  { %v3253_v61 = vpop.eup %3252  ;;  %v633_v62 = vmul.f32 %v3251_v60, %v3235_v14 }
 0x40a   :  { %v634_v2 = vmul.f32 %v3253_v61, %v3237_v15 }
 0x40b   :  { %v641_v4 = vpack.c.bf16 %v633_v62, %v633_v62 }
 0x40c   :  { %v642_v5 = vpack.c.bf16 %v634_v2, %v634_v2 }
 0x40d   :  { %2909 = vmatmul.mubr.msk.bf16.vlgmr.msra.gmra.mxu1 %vm163_vm2, %v641_v4  ;;  %v3204_v4 = vld [vmem:[%s4075_s4 + $0x8] sm:$0xff]  }
 0x40e   :  { %2915 = vmatmul.mubr.msk.bf16.vlgmr.msra.gmra.mxu0 %vm163_vm2, %v642_v5  ;;  %2919 = vmatpush3.bf16.msra.mxu1 %v752_v6 }
 0x40f   :  { %2925 = vmatpush3.bf16.msra.mxu0 %v800_v8  ;;  %986 = vrot.lane.b32.xlu1 %v3470_v48, %s3342_s22 }
 0x410   :  { %2920 = vmatprep.mubr.msk.bf16.mxu1 %vm3337_vm1, %v3336_v7  ;;  %2930 = vmatprep.subr.bf16.mxu1 %v3336_v7 }
 0x411   :  { %2926 = vmatprep.mubr.msk.bf16.mxu0 %vm3337_vm1, %v3336_v7  ;;  %2936 = vmatprep.subr.bf16.mxu0 %v3336_v7 }
 0x418   :  { %938 = vrot.lane.b32.xlu0 %v3444_v34, %s3342_s22 }
 0x44e   :  { %v609_v10 = vpop.xlane.xlu1 %608 }
 0x44f   :  { %3254 = vrcp.f32 %v609_v10  ;;  %v3205_v10 = vld [vmem:[%s4075_s4] sm:$0xff]  }
 0x452   :  { %v612_v12 = vpop.xlane.xlu0 %611  ;;  %v891_v29 = vpop.permute.xlu1 %890 }
 0x453   :  { %3256 = vrcp.f32 %v612_v12  ;;  %v896_v19 = vsel %vm654_vm3, %v891_v29, 0 }
 0x456   :  { %v843_v14 = vpop.permute.xlu0 %842 }
 0x457   :  { %v848_v36 = vsel %vm654_vm3, %v843_v14, 0 }
 0x45c   :  { %v3255_v13 = vpop.eup %3254 }
 0x45d   :  { %v635_v48 = vmul.f32 %v3255_v13, %v3596_v23 }
 0x45f   :  { %v643_v15 = vpack.c.bf16 %v635_v48, %v635_v48 }
 0x460   :  { %v3257_v17 = vpop.eup %3256 }
 0x461   :  { %2921 = vmatmul.mubr.msk.bf16.vlgmr.msra.gmra.mxu1 %vm163_vm2, %v643_v15  ;;  %v636_v38 = vmul.f32 %v3257_v17, %v3600_v28 }
 0x462   :  { %2931 = vmatpush3.bf16.msra.mxu1 %v848_v36  ;;  %2932 = vmatprep.mubr.msk.bf16.mxu1 %vm3337_vm1, %v3336_v7 }
 0x463   :  { %v644_v34 = vpack.c.bf16 %v636_v38, %v636_v38  ;;  %2942 = vmatprep.subr.bf16.mxu1 %v3336_v7 }
 0x465   :  { %2927 = vmatmul.mubr.msk.bf16.vlgmr.msra.gmra.mxu0 %vm163_vm2, %v644_v34 }
 0x466   :  { %2937 = vmatpush3.bf16.msra.mxu0 %v896_v19  ;;  %2938 = vmatprep.mubr.msk.bf16.mxu0 %vm3337_vm1, %v3336_v7 }
 0x467   :  { %2948 = vmatprep.subr.bf16.mxu0 %v3336_v7 }
 0x483   :  { %v615_v21 = vpop.xlane.xlu1 %614 }
 0x484   :  { %3258 = vrcp.f32 %v615_v21 }
 0x487   :  { %v621_v3 = vpop.xlane.xlu1 %620  ;;  %v618_v11 = vpop.xlane.xlu0 %617 }
 0x488   :  { %3260 = vrcp.f32 %v621_v3 }
 0x489   :  { %3262 = vrcp.f32 %v618_v11 }
 0x48b   :  { %v624_v22 = vpop.xlane.xlu0 %623  ;;  %v987_v33 = vpop.permute.xlu1 %986 }
 0x48c   :  { %3264 = vrcp.f32 %v624_v22  ;;  %v992_v41 = vsel %vm654_vm3, %v987_v33, 0 }
 0x48f   :  { %v939_v26 = vpop.permute.xlu0 %938 }
 0x490   :  { %v944_v31 = vsel %vm654_vm3, %v939_v26, 0 }
 0x491   :  { %v3259_v23 = vpop.eup %3258 }
 0x492   :  { %v637_v25 = vmul.f32 %v3259_v23, %v3612_v46 }
 0x494   :  { %v645_v28 = vpack.c.bf16 %v637_v25, %v637_v25 }
 0x495   :  { %v3261_v30 = vpop.eup %3260 }
 0x496   :  { %v3263_v18 = vpop.eup %3262  ;;  %2933 = vmatmul.mubr.msk.bf16.vlgmr.msra.gmra.mxu1 %vm163_vm2, %v645_v28  ;;  %v639_v35 = vmul.f32 %v3261_v30, %v3618_v42 }
 0x497   :  { %2943 = vmatpush3.bf16.msra.mxu1 %v944_v31  ;;  %v638_v24 = vmul.f32 %v3263_v18, %v3614_v43  ;;  %2944 = vmatprep.mubr.msk.bf16.mxu1 %vm3337_vm1, %v3336_v7 }
 0x498   :  { %2954 = vmatprep.subr.bf16.mxu1 %v3336_v7  ;;  %v647_v44 = vpack.c.bf16 %v639_v35, %v639_v35 }
 0x499   :  { %v646_v39 = vpack.c.bf16 %v638_v24, %v638_v24  ;;  %v3265_v40 = vpop.eup %3264 }
 0x49a   :  { %v640_v45 = vmul.f32 %v3265_v40, %v3624_v58 }
 0x49b   :  { %2939 = vmatmul.mubr.msk.bf16.vlgmr.msra.gmra.mxu0 %vm163_vm2, %v646_v39 }
 0x49c   :  { %2949 = vmatpush3.bf16.msra.mxu0 %v992_v41  ;;  %2950 = vmatprep.mubr.msk.bf16.mxu0 %vm3337_vm1, %v3336_v7  ;;  %v648_v49 = vpack.c.bf16 %v640_v45, %v640_v45 }
 0x49d   :  { %2962 = vmatprep.subr.bf16.mxu0 %v3336_v7 }
 0x49e   :  { %2945 = vmatmul.mubr.msk.bf16.vlgmr.msra.gmra.mxu1 %vm163_vm2, %v647_v44 }
 0x49f   :  { %2958 = vmatprep.mubr.msk.bf16.mxu1 %vm3337_vm1, %v3336_v7  ;;  %2955 = vmatpush3.bf16.msra.mxu1 %v3204_v4 }
 0x4a0   :  { %2956 = vmatprep.subr.bf16.mxu1 %v3336_v7 }
 0x4a3   :  { %2951 = vmatmul.mubr.msk.bf16.vlgmr.msra.gmra.mxu0 %vm163_vm2, %v648_v49  ;;  %2957 = vmatpush3.bf16.msra.mxu1 %v3205_v10 }
 0x4a4   :  { %2966 = vmatprep.mubr.msk.bf16.mxu0 %vm3337_vm1, %v3336_v7  ;;  %2970 = vmatprep.subr.bf16.mxu1 %v3336_v7 }
 0x4cd   :  { %v692_v50 = vpop.f32.mrf.mxu1 }
 0x4ce   :  { %v740_v51 = vpop.f32.mrf.mxu0 }
 0x4cf   :  { %v2910_v46 = vpop.f32.mrf.mxu1 }
 0x4d0   :  { %v2916_v53 = vpop.f32.mrf.mxu0 }
 0x4d1   :  { %v695_v43 = vpop.f32.mrf.mxu1 }
 0x4d2   :  { %v743_v32 = vpop.f32.mrf.mxu0 }
 0x4d3   :  { %v2911_v42 = vpop.f32.mrf.mxu1 }
 0x4d4   :  { %v2917_v52 = vpop.f32.mrf.mxu0 }
 0x521   :  { %v788_v54 = vpop.f32.mrf.mxu1 }
 0x523   :  { %v2922_v56 = vpop.f32.mrf.mxu1 }
 0x525   :  { %v791_v57 = vpop.f32.mrf.mxu1  ;;  %v836_v58 = vpop.f32.mrf.mxu0 }
 0x526   :  { %v3157_v59 = vpack.i.bf16 %v836_v58, %v788_v54  ;;  %v3208_v57 = vld [vmem:[%s4078_s7 + $0x38] sm:$0xff]   ;;  %v3209_v58 = vld [vmem:[%s4078_s7 + $0x30] sm:$0xff]  }
 0x527   :  { %v2923_v60 = vpop.f32.mrf.mxu1  ;;  %v2928_v61 = vpop.f32.mrf.mxu0 }
 0x528   :  { %3158 = vrot.lane.b32.xlu0 %v3157_v59, %s3343_s1  ;;  %v3210_v59 = vld [vmem:[%s4078_s7 + $0x28] sm:$0xff]   ;;  %v3211_v60 = vld [vmem:[%s4078_s7 + $0x20] sm:$0xff]   ;;  %v3212_v61 = vld [vmem:[%s4078_s7 + $0x18] sm:$0xff]  }
 0x529   :  { %v839_v62 = vpop.f32.mrf.mxu0 }
 0x52a   :  { %v3213_v62 = vld [vmem:[%s4078_s7 + $0x10] sm:$0xff]  }
 0x52b   :  { %v2929_v2 = vpop.f32.mrf.mxu0 }
 0x556   :  { %v884_v5 = vpop.f32.mrf.mxu1 }
 0x558   :  { %v2934_v6 = vpop.f32.mrf.mxu1 }
 0x55a   :  { %v887_v8 = vpop.f32.mrf.mxu1 }
 0x55b   :  { %v932_v12 = vpop.f32.mrf.mxu0 }
 0x55c   :  { %v3162_v13 = vpack.i.bf16 %v932_v12, %v884_v5  ;;  %v2935_v48 = vpop.f32.mrf.mxu1 }
 0x55d   :  { %v2940_v14 = vpop.f32.mrf.mxu0 }
 0x55e   :  { %3163 = vrot.lane.b32.xlu1 %v3162_v13, %s3344_s26  ;;  %v980_v15 = vpop.f32.mrf.mxu1  ;;  %v2672_v14 = vld [vmem:[%s4076_s5] ss:$0 sm:$0xff] }
 0x55f   :  { %v935_v17 = vpop.f32.mrf.mxu0 }
 0x560   :  { %v2946_v36 = vpop.f32.mrf.mxu1 }
 0x561   :  { %v2941_v38 = vpop.f32.mrf.mxu0 }
 0x562   :  { %v983_v29 = vpop.f32.mrf.mxu1 }
 0x563   :  { %v1028_v34 = vpop.f32.mrf.mxu0  ;;  %v3214_v29 = vld [vmem:[%s4078_s7 + $0x8] sm:$0xff]  }
 0x564   :  { %v3167_v19 = vpack.i.bf16 %v1028_v34, %v980_v15  ;;  %v2947_v21 = vpop.f32.mrf.mxu1  ;;  %v3215_v34 = vld [vmem:[%s4078_s7] sm:$0xff]  }
 0x565   :  { %v2952_v3 = vpop.f32.mrf.mxu0 }
 0x566   :  { %3168 = vrot.lane.b32.xlu0 %v3167_v19, %s3345_s27 }
 0x567   :  { %v1031_v11 = vpop.f32.mrf.mxu0 }
 0x569   :  { %v2953_v22 = vpop.f32.mrf.mxu0 }
 0x59a   :  { %v3159_v23 = vpop.permute.xlu0 %3158 }
 0x59b   :  { %v3161_v26 = vunpack.i.h.bf16 %v3159_v23  ;;  %v3160_v28 = vunpack.i.l.bf16 %v3159_v23 }
 0x59d   :  { %v1059_v24 = vsel %vm163_vm2, %v740_v51, %v3161_v26  ;;  %v1058_v33 = vsel %vm163_vm2, %v692_v50, %v3160_v28 }
 0x5d0   :  { %v3164_v25 = vpop.permute.xlu1 %3163 }
 0x5d1   :  { %v3166_v30 = vunpack.i.h.bf16 %v3164_v25  ;;  %v3165_v18 = vunpack.i.l.bf16 %v3164_v25 }
 0x5d3   :  { %v1061_v40 = vsel %vm1060_vm4, %v1058_v33, %v3165_v18  ;;  %v1062_v41 = vsel %vm1060_vm4, %v1059_v24, %v3166_v30 }
 0x5d8   :  { %v3169_v31 = vpop.permute.xlu0 %3168 }
 0x5d9   :  { %v3171_v35 = vunpack.i.h.bf16 %v3169_v31  ;;  %v3170_v39 = vunpack.i.l.bf16 %v3169_v31 }
 0x5db   :  { %v1064_v44 = vsel %vm1063_vm5, %v1061_v40, %v3170_v39  ;;  %v1065_v45 = vsel %vm1063_vm5, %v1062_v41, %v3171_v35  ;;  %v3216_v41 = vld [vmem:[%s4074_s3 + $0x18] sm:$0xff]  }
 0x5dc   :  { %v1066_v49 = vpack.c.bf16 %v1065_v45, %v1064_v44  ;;  %v3217_v44 = vld [vmem:[%s4074_s3 + $0x10] sm:$0xff]  }
 0x5de   :  { %2959 = vmatmul.mubr.msk.bf16.vlgmr.msra.gmra.mxu1 %vm47_vm0, %v1066_v49 }
 0x5df   :  { %2986 = vmatprep.mubr.msk.bf16.mxu1 %vm3337_vm1, %v3336_v7  ;;  %2971 = vmatpush3.bf16.msra.mxu1 %v3208_v57 }
 0x5e0   :  { %2972 = vmatprep.subr.bf16.mxu1 %v3336_v7 }
 0x5e3   :  { %2973 = vmatpush3.bf16.msra.mxu1 %v3209_v58 }
 0x5e4   :  { %2974 = vmatprep.subr.bf16.mxu1 %v3336_v7 }
 0x5e7   :  { %2975 = vmatpush3.bf16.msra.mxu1 %v3210_v59 }
 0x5e8   :  { %2976 = vmatprep.subr.bf16.mxu1 %v3336_v7 }
 0x5eb   :  { %2977 = vmatpush3.bf16.msra.mxu1 %v3211_v60 }
 0x5ec   :  { %2978 = vmatprep.subr.bf16.mxu1 %v3336_v7 }
 0x5ef   :  { %2979 = vmatpush3.bf16.msra.mxu1 %v3212_v61 }
 0x5f0   :  { %2980 = vmatprep.subr.bf16.mxu1 %v3336_v7 }
 0x5f3   :  { %2981 = vmatpush3.bf16.msra.mxu1 %v3213_v62 }
 0x5f4   :  { %2982 = vmatprep.subr.bf16.mxu1 %v3336_v7 }
 0x5f7   :  { %2983 = vmatpush3.bf16.msra.mxu1 %v3214_v29 }
 0x5f8   :  { %2984 = vmatprep.subr.bf16.mxu1 %v3336_v7 }
 0x5fb   :  { %2985 = vmatpush3.bf16.msra.mxu1 %v3215_v34 }
 0x5fc   :  { %3016 = vmatprep.subr.bf16.mxu1 %v3336_v7 }
 0x69e   :  { %v1120_v46 = vpop.f32.mrf.mxu1 }
 0x69f   :  { %v3695_v51 = vadd.f32 %v1120_v46, %v3401_v0  ;;  %v3206_v0 = vld [vmem:[%s4077_s6 + $0x8] sm:$0xff]  }
 0x6a0   :  { %v2960_v50 = vpop.f32.mrf.mxu1  ;;  %2963 = vmatpush3.bf16.msra.mxu0 %v3206_v0 }
 0x6a1   :  { %v1130_v53 = vmul.f32 %v3695_v51, %v3695_v51  ;;  %2964 = vmatprep.subr.bf16.mxu0 %v3336_v7 }
 0x6a2   :  { %v1123_v43 = vpop.f32.mrf.mxu1 }
 0x6a3   :  { %v3700_v32 = vadd.f32 %v1123_v43, %v3406_v1  ;;  %v1132_v42 = vsel %vm47_vm0, %v1130_v53, 0.0  ;;  %v3207_v1 = vld [vmem:[%s4077_s6] sm:$0xff]  }
 0x6a4   :  { %1133 = vadd.xlane.f32.xlu1 %v1132_v42  ;;  %v2961_v52 = vpop.f32.mrf.mxu1  ;;  %2965 = vmatpush3.bf16.msra.mxu0 %v3207_v1 }
 0x6a5   :  { %v1131_v54 = vmul.f32 %v3700_v32, %v3700_v32  ;;  %2990 = vmatprep.subr.bf16.mxu0 %v3336_v7  ;;  %v2685_v52 = vld [vmem:[%s4073_s2 + $0x1] ss:$0 sm:$0xff]  ;;  %s3346_s2 = smov [#allocation2]  }
 0x6a6   :  { %s2638_s3 = sshll.u32 %s3346_s2, 4  ;;  %s2639_s3 = int_to_ptr.vmem [resolvable:$true] %s2638_s3 }
 0x6a7   :  { %v1135_v56 = vsel %vm47_vm0, %v1131_v54, 0.0  ;;  %p3319_p1 = scmp.lt.s32.totalorder %s2639_s3, %s2639_s3 }
 0x6a8   :  { %1136 = vadd.xlane.f32.xlu0 %v1135_v56 }
 0x72d   :  { %v1134_v2 = vpop.xlane.xlu1 %1133 }
 0x72e   :  { %v1138_v4 = vmul.f32 0.03125, %v1134_v2 }
 0x730   :  { %v1140_v5 = vadd.f32 1e-06, %v1138_v4 }
 0x731   :  { %v1137_v6 = vpop.xlane.xlu0 %1136 }
 0x732   :  { %3266 = vrsqrt.f32 %v1140_v5  ;;  %v1139_v8 = vmul.f32 0.03125, %v1137_v6 }
 0x734   :  { %v1141_v10 = vadd.f32 1e-06, %v1139_v8 }
 0x736   :  { %3268 = vrsqrt.f32 %v1141_v10 }
 0x73f   :  { %v3267_v12 = vpop.eup %3266 }
 0x740   :  { %v1144_v13 = vmul.f32 %v3267_v12, %v3695_v51 }
 0x742   :  { %v1152_v17 = vmul.f32 %v2672_v14, %v1144_v13 }
 0x743   :  { %v3269_v48 = vpop.eup %3268 }
 0x744   :  { %v1145_v15 = vmul.f32 %v3269_v48, %v3700_v32 }
 0x746   :  { %v1153_v36 = vmul.f32 %v2672_v14, %v1145_v15 }
 0x748   :  { %v1154_v38 = vpack.c.bf16 %v1153_v36, %v1152_v17 }
 0x74a   :  { %2967 = vmatmul.mubr.msk.bf16.vlgmr.msra.gmra.mxu0 %vm47_vm0, %v1154_v38 }
 0x74b   :  { %2994 = vmatprep.mubr.msk.bf16.mxu0 %vm3337_vm1, %v3336_v7  ;;  %2991 = vmatpush3.bf16.msra.mxu0 %v3216_v41 }
 0x74c   :  { %2992 = vmatprep.subr.bf16.mxu0 %v3336_v7 }
 0x74f   :  { %2993 = vmatpush3.bf16.msra.mxu0 %v3217_v44 }
 0x750   :  { %2998 = vmatprep.subr.bf16.mxu0 %v3336_v7 }
 0x80a   :  { %v1208_v19 = vpop.f32.mrf.mxu0 }
 0x80b   :  { %v1215_v11 = vmax.f32 %v1208_v19, 0.0 }
 0x80c   :  { %v2968_v21 = vpop.f32.mrf.mxu0 }
 0x80e   :  { %v1211_v3 = vpop.f32.mrf.mxu0 }
 0x80f   :  { %v1216_v22 = vmax.f32 %v1211_v3, 0.0 }
 0x810   :  { %v2969_v23 = vpop.f32.mrf.mxu0 }
 0x811   :  { %v1217_v25 = vpack.c.bf16 %v1216_v22, %v1215_v11 }
 0x813   :  { %2987 = vmatmul.mubr.bf16.vlgmr.msra.gmra.mxu1 %v1217_v25 }
 0x814   :  { %3018 = vmatprep.mubr.msk.bf16.mxu1 %vm3337_vm1, %v3336_v7 }
 0x8d3   :  { %v1316_v26 = vpop.f32.mrf.mxu1 }
 0x8d4   :  { %v3757_v28 = vadd.f32 %v1316_v26, %v3695_v51 }
 0x8d5   :  { %v2988_v30 = vpop.f32.mrf.mxu1 }
 0x8d6   :  { %v1327_v18 = vmul.f32 %v3757_v28, %v3757_v28 }
 0x8d7   :  { %v1319_v31 = vpop.f32.mrf.mxu1 }
 0x8d8   :  { %v3762_v24 = vadd.f32 %v1319_v31, %v3700_v32  ;;  %v1329_v33 = vsel %vm47_vm0, %v1327_v18, 0.0 }
 0x8d9   :  { %1330 = vadd.xlane.f32.xlu0 %v1329_v33  ;;  %v2989_v35 = vpop.f32.mrf.mxu1 }
 0x8da   :  { %v1328_v39 = vmul.f32 %v3762_v24, %v3762_v24 }
 0x8dc   :  { %v1332_v40 = vsel %vm47_vm0, %v1328_v39, 0.0 }
 0x8dd   :  { %1333 = vadd.xlane.f32.xlu1 %v1332_v40 }
 0x962   :  { %v1331_v45 = vpop.xlane.xlu0 %1330 }
 0x963   :  { %v1335_v49 = vmul.f32 0.03125, %v1331_v45 }
 0x965   :  { %v1337_v46 = vadd.f32 1e-06, %v1335_v49 }
 0x966   :  { %v1334_v51 = vpop.xlane.xlu1 %1333 }
 0x967   :  { %3270 = vrsqrt.f32 %v1337_v46  ;;  %v1336_v50 = vmul.f32 0.03125, %v1334_v51 }
 0x969   :  { %v1338_v53 = vadd.f32 1e-06, %v1336_v50 }
 0x96b   :  { %3272 = vrsqrt.f32 %v1338_v53 }
 0x974   :  { %v3271_v43 = vpop.eup %3270 }
 0x975   :  { %v1341_v32 = vmul.f32 %v3271_v43, %v3757_v28 }
 0x977   :  { %v1349_v56 = vmul.f32 %v2685_v52, %v1341_v32 }
 0x978   :  { %v3273_v42 = vpop.eup %3272 }
 0x979   :  { %v1342_v54 = vmul.f32 %v3273_v42, %v3762_v24 }
 0x97b   :  { %v1350_v0 = vmul.f32 %v2685_v52, %v1342_v54 }
 0x97d   :  { %v1351_v1 = vpack.c.bf16 %v1350_v0, %v1349_v56 }
 0x97f   :  { %2995 = vmatmul.mubr.msk.bf16.vlgmr.msra.gmra.mxu0 %vm47_vm0, %v1351_v1 }
 0x980   :  { %3000 = vmatprep.mubr.msk.bf16.mxu0 %vm3337_vm1, %v3336_v7 }
 0xa3f   :  { %v1406_v57 = vpop.f32.mrf.mxu0 }
 0xa40   :  { %v1433_v62 = vpack.c.bf16 %v1406_v57, %v1406_v57 }
 0xa41   :  { %v2996_v58 = vpop.f32.mrf.mxu0 }
 0xa43   :  { %v1409_v59 = vpop.f32.mrf.mxu0 }
 0xa44   :  { %v3177_v60 = vpack.i.bf16 %v1409_v59, %v1406_v57  ;;  %v3788_v2 = vpack.c.bf16 %v1409_v59, %v1409_v59 }
 0xa45   :  { %v2997_v61 = vpop.f32.mrf.mxu0 }
 0xa46   :  { %3178 = vrot.lane.b32.xlu1 %v3177_v60, %s3340_s20  ;;  %3173 = vrot.lane.b32.xlu0 %v3177_v60, %s3339_s19 }
 0xa4a   :  { %3183 = vrot.lane.b32.xlu1 %v3177_v60, %s3338_s18  ;;  %1442 = vrot.lane.b32.xlu0 %v1433_v62, %s3341_s21  ;;  %s3314_s18 = scalar_lea.vmem %s2639_s3, 256 }
 0xa4b   :  { %p3315_p0 = scmp.ne.s32.totalorder %s2639_s3, %s3314_s18  ;;  %p3320_p2 = scmp.lt.s32.totalorder %s3314_s18, %s3314_s18 }
 0xa4d   :  { %p3321_p3 = por %p3320_p2, %p3319_p1 }
 0xa4e   :  { %1491 = vrot.lane.b32.xlu1 %v3788_v2, %s3341_s21 }
 0xa4f   :  { %p3322_p4 = pnand %p3321_p3, %p3315_p0 }
 0xab8   :  { %v3179_v4 = vpop.permute.xlu1 %3178  ;;  %v3174_v5 = vpop.permute.xlu0 %3173 }
 0xab9   :  { %v3176_v6 = vunpack.i.h.bf16 %v3174_v5  ;;  %v3175_v8 = vunpack.i.l.bf16 %v3174_v5  ;;  %v3181_v10 = vunpack.i.h.bf16 %v3179_v4  ;;  %v3180_v12 = vunpack.i.l.bf16 %v3179_v4 }
 0xabb   :  { %v3792_v13 = vpack.c.bf16 %v3176_v6, %v3176_v6  ;;  %v3794_v48 = vpack.c.bf16 %v3175_v8, %v3175_v8  ;;  %v3801_v36 = vpack.c.bf16 %v3181_v10, %v3181_v10  ;;  %v3803_v38 = vpack.c.bf16 %v3180_v12, %v3180_v12 }
 0xabc   :  { %v3184_v14 = vpop.permute.xlu1 %3183  ;;  %v1443_v15 = vpop.permute.xlu0 %1442 }
 0xabd   :  { %v1448_v17 = vsel %vm163_vm2, %v1443_v15, 0  ;;  %1540 = vrot.lane.b32.xlu0 %v3794_v48, %s3341_s21  ;;  %1589 = vrot.lane.b32.xlu1 %v3792_v13, %s3341_s21  ;;  %v3185_v29 = vunpack.i.l.bf16 %v3184_v14  ;;  %v3186_v34 = vunpack.i.h.bf16 %v3184_v14 }
 0xabe   :  { %2999 = vmatpush3.bf16.xpose.msra.mxu0 %v1448_v17 }
 0xabf   :  { %3004 = vmatprep.subr.bf16.mxu0 %v3336_v7  ;;  %v3810_v21 = vpack.c.bf16 %v3185_v29, %v3185_v29  ;;  %v3812_v3 = vpack.c.bf16 %v3186_v34, %v3186_v34 }
 0xac0   :  { %v1492_v19 = vpop.permute.xlu1 %1491 }
 0xac1   :  { %1638 = vrot.lane.b32.xlu0 %v3803_v38, %s3341_s21  ;;  %1687 = vrot.lane.b32.xlu1 %v3801_v36, %s3341_s21  ;;  %v1497_v11 = vsel %vm163_vm2, %v1492_v19, 0 }
 0xac5   :  { %3001 = vmatmul.mubr.msk.bf16.vlgmr.msra.gmra.mxu0 %vm163_vm2, %v1433_v62  ;;  %1736 = vrot.lane.b32.xlu0 %v3810_v21, %s3341_s21 }
 0xac6   :  { %1785 = vrot.lane.b32.xlu1 %v3812_v3, %s3341_s21  ;;  %3005 = vmatpush3.bf16.xpose.msra.mxu0 %v1497_v11 }
 0xac7   :  { %3006 = vmatprep.mubr.msk.bf16.mxu0 %vm3337_vm1, %v3336_v7  ;;  %3010 = vmatprep.subr.bf16.mxu0 %v3336_v7 }
 0xaca   :  { %1929 = vrot.lane.b32.xlu1 %v1433_v62, %s3342_s22 }
 0xacd   :  { %3007 = vmatmul.mubr.msk.bf16.vlgmr.msra.gmra.mxu0 %vm163_vm2, %v3788_v2 }
 0xace   :  { %3012 = vmatprep.mubr.msk.bf16.mxu0 %vm3337_vm1, %v3336_v7 }
 0xb2f   :  { %v1541_v22 = vpop.permute.xlu0 %1540  ;;  %v1590_v23 = vpop.permute.xlu1 %1589 }
 0xb30   :  { %v1546_v25 = vsel %vm163_vm2, %v1541_v22, 0  ;;  %v1595_v26 = vsel %vm163_vm2, %v1590_v23, 0 }
 0xb31   :  { %3011 = vmatpush3.bf16.xpose.msra.mxu0 %v1546_v25  ;;  %3017 = vmatpush3.bf16.xpose.msra.mxu1 %v1595_v26 }
 0xb32   :  { %3022 = vmatprep.subr.bf16.mxu0 %v3336_v7  ;;  %3028 = vmatprep.subr.bf16.mxu1 %v3336_v7 }
 0xb33   :  { %v1639_v30 = vpop.permute.xlu0 %1638  ;;  %v1688_v18 = vpop.permute.xlu1 %1687 }
 0xb34   :  { %v1644_v31 = vsel %vm163_vm2, %v1639_v30, 0  ;;  %v1693_v33 = vsel %vm163_vm2, %v1688_v18, 0 }
 0xb37   :  { %v1737_v35 = vpop.permute.xlu0 %1736 }
 0xb38   :  { %3013 = vmatmul.mubr.msk.bf16.vlgmr.msra.gmra.mxu0 %vm163_vm2, %v3794_v48  ;;  %3019 = vmatmul.mubr.msk.bf16.vlgmr.msra.gmra.mxu1 %vm163_vm2, %v3792_v13  ;;  %v1786_v39 = vpop.permute.xlu1 %1785  ;;  %v1742_v40 = vsel %vm163_vm2, %v1737_v35, 0 }
 0xb39   :  { %3023 = vmatpush3.bf16.xpose.msra.mxu0 %v1644_v31  ;;  %3029 = vmatpush3.bf16.xpose.msra.mxu1 %v1693_v33  ;;  %v1791_v41 = vsel %vm163_vm2, %v1786_v39, 0 }
 0xb3a   :  { %3024 = vmatprep.mubr.msk.bf16.mxu0 %vm3337_vm1, %v3336_v7  ;;  %3030 = vmatprep.mubr.msk.bf16.mxu1 %vm3337_vm1, %v3336_v7 }
 0xb3b   :  { %3034 = vmatprep.subr.bf16.mxu0 %v3336_v7  ;;  %3040 = vmatprep.subr.bf16.mxu1 %v3336_v7 }
 0xb3c   :  { %v1930_v44 = vpop.permute.xlu1 %1929 }
 0xb3d   :  { %v1935_v45 = vsel %vm654_vm3, %v1930_v44, 0 }
 0xb40   :  { %3025 = vmatmul.mubr.msk.bf16.vlgmr.msra.gmra.mxu0 %vm163_vm2, %v3803_v38  ;;  %3031 = vmatmul.mubr.msk.bf16.vlgmr.msra.gmra.mxu1 %vm163_vm2, %v3801_v36 }
 0xb41   :  { %3035 = vmatpush3.bf16.xpose.msra.mxu0 %v1742_v40  ;;  %3041 = vmatpush3.bf16.xpose.msra.mxu1 %v1791_v41 }
 0xb42   :  { %3036 = vmatprep.mubr.msk.bf16.mxu0 %vm3337_vm1, %v3336_v7  ;;  %3042 = vmatprep.mubr.msk.bf16.mxu1 %vm3337_vm1, %v3336_v7 }
 0xb43   :  { %3046 = vmatprep.subr.bf16.mxu0 %v3336_v7  ;;  %3052 = vmatprep.subr.bf16.mxu1 %v3336_v7 }
 0xb48   :  { %3037 = vmatmul.mubr.msk.bf16.vlgmr.msra.gmra.mxu0 %vm163_vm2, %v3810_v21  ;;  %3043 = vmatmul.mubr.msk.bf16.vlgmr.msra.gmra.mxu1 %vm163_vm2, %v3812_v3 }
 0xb49   :  { %3047 = vmatpush3.bf16.msra.mxu0 %v1935_v45  ;;  %3054 = vmatprep.mubr.msk.bf16.mxu1 %vm3337_vm1, %v3336_v7 }
 0xb4a   :  { %3048 = vmatprep.mubr.msk.bf16.mxu0 %vm3337_vm1, %v3336_v7  ;;  %3058 = vmatprep.subr.bf16.mxu0 %v3336_v7 }
 0xb85   :  { %v1484_v49 = vpop.f32.mrf.mxu0 }
 0xb86   :  { %v3867_v46 = vadd.f32 %v1484_v49, %v3521_v63 }
 0xb87   :  { %v3002_v51 = vpop.f32.mrf.mxu0 }
 0xb88   :  { %v1833_v50 = vsel %vm163_vm2, %v3867_v46, -inf }
 0xb89   :  { %1834 = vmax.xlane.f32.xlu0 %v1833_v50  ;;  %v1487_v53 = vpop.f32.mrf.mxu0 }
 0xb8b   :  { %v3003_v43 = vpop.f32.mrf.mxu0 }
 0xb8d   :  { %v1533_v32 = vpop.f32.mrf.mxu0 }
 0xb8e   :  { %v1534_v42 = vadd.f32 %v1533_v32, %v3531_v9 }
 0xb8f   :  { %v3008_v52 = vpop.f32.mrf.mxu0 }
 0xb90   :  { %v1836_v54 = vsel %vm163_vm2, %v1534_v42, -inf }
 0xb91   :  { %1837 = vmax.xlane.f32.xlu1 %v1836_v54  ;;  %v1536_v56 = vpop.f32.mrf.mxu0 }
 0xb93   :  { %v3009_v0 = vpop.f32.mrf.mxu0 }
 0xbf8   :  { %v1582_v1 = vpop.f32.mrf.mxu0  ;;  %v1631_v57 = vpop.f32.mrf.mxu1 }
 0xbf9   :  { %v1583_v63 = vadd.f32 %v1582_v1, %v3538_v16  ;;  %v1632_v60 = vadd.f32 %v1631_v57, %v3546_v20 }
 0xbfa   :  { %v3014_v58 = vpop.f32.mrf.mxu0  ;;  %v3020_v59 = vpop.f32.mrf.mxu1 }
 0xbfb   :  { %v1839_v61 = vsel %vm163_vm2, %v1583_v63, -inf  ;;  %v1842_v6 = vsel %vm163_vm2, %v1632_v60, -inf }
 0xbfc   :  { %1840 = vmax.xlane.f32.xlu0 %v1839_v61  ;;  %v1585_v62 = vpop.f32.mrf.mxu0  ;;  %v1634_v4 = vpop.f32.mrf.mxu1 }
 0xbfe   :  { %v3015_v9 = vpop.f32.mrf.mxu0  ;;  %v3021_v5 = vpop.f32.mrf.mxu1 }
 0xc00   :  { %v1680_v8 = vpop.f32.mrf.mxu0  ;;  %1843 = vmax.xlane.f32.xlu0 %v1842_v6  ;;  %v1729_v10 = vpop.f32.mrf.mxu1 }
 0xc01   :  { %v3878_v12 = vadd.f32 %v1680_v8, %v3554_v27  ;;  %v3881_v16 = vadd.f32 %v1729_v10, %v3563_v37 }
 0xc02   :  { %v3026_v14 = vpop.f32.mrf.mxu0  ;;  %v3032_v20 = vpop.f32.mrf.mxu1 }
 0xc03   :  { %v1845_v15 = vsel %vm163_vm2, %v3878_v12, -inf  ;;  %v1848_v17 = vsel %vm163_vm2, %v3881_v16, -inf }
 0xc04   :  { %1846 = vmax.xlane.f32.xlu1 %v1845_v15  ;;  %v1683_v29 = vpop.f32.mrf.mxu0  ;;  %1849 = vmax.xlane.f32.xlu0 %v1848_v17  ;;  %v1732_v34 = vpop.f32.mrf.mxu1 }
 0xc06   :  { %v3027_v19 = vpop.f32.mrf.mxu0  ;;  %v3033_v11 = vpop.f32.mrf.mxu1 }
 0xc08   :  { %v1778_v22 = vpop.f32.mrf.mxu0  ;;  %v1827_v27 = vpop.f32.mrf.mxu1 }
 0xc09   :  { %v1779_v23 = vadd.f32 %v1778_v22, %v3573_v47  ;;  %v1828_v37 = vadd.f32 %v1827_v27, %v3581_v55 }
 0xc0a   :  { %v3038_v25 = vpop.f32.mrf.mxu0  ;;  %v3044_v26 = vpop.f32.mrf.mxu1 }
 0xc0b   :  { %v1851_v30 = vsel %vm163_vm2, %v1779_v23, -inf  ;;  %v1854_v18 = vsel %vm163_vm2, %v1828_v37, -inf }
 0xc0c   :  { %1852 = vmax.xlane.f32.xlu1 %v1851_v30  ;;  %v1781_v31 = vpop.f32.mrf.mxu0  ;;  %1855 = vmax.xlane.f32.xlu0 %v1854_v18  ;;  %v1830_v33 = vpop.f32.mrf.mxu1 }
 0xc0e   :  { %v3039_v35 = vpop.f32.mrf.mxu0  ;;  %v3045_v39 = vpop.f32.mrf.mxu1 }
 0xc12   :  { %v1835_v40 = vpop.xlane.xlu0 %1834 }
 0xc13   :  { %v1857_v41 = vsub.f32 %v3867_v46, %v1835_v40 }
 0xc15   :  { %v1865_v45 = vmul.f32 1.442695, %v1857_v41 }
 0xc1a   :  { %v1838_v47 = vpop.xlane.xlu1 %1837 }
 0xc1b   :  { %v1858_v55 = vsub.f32 %v1534_v42, %v1838_v47 }
 0xc1d   :  { %2025 = vrot.lane.b32.xlu1 %v3794_v48, %s3342_s22  ;;  %v1867_v44 = vmul.f32 1.442695, %v1858_v55 }
 0xc1f   :  { %3274 = vpow2.f32 %v1867_v44 }
 0xc20   :  { %3276 = vpow2.f32 %v1865_v45 }
 0xc21   :  { %2073 = vrot.lane.b32.xlu1 %v3792_v13, %s3342_s22 }
 0xc22   :  { %1977 = vrot.lane.b32.xlu0 %v3788_v2, %s3342_s22 }
 0xc2c   :  { %v3275_v49 = vpop.eup %3274 }
 0xc2d   :  { %v1884_v51 = vsel %vm163_vm2, %v3275_v49, 0.0  ;;  %v3899_v50 = vpop.eup %3276 }
 0xc2e   :  { %v1881_v13 = vsel %vm163_vm2, %v3899_v50, 0.0 }
 0xc41   :  { %1885 = vadd.xlane.f32.xlu0 %v1884_v51 }
 0xc45   :  { %1882 = vadd.xlane.f32.xlu1 %v1881_v13 }
 0xc85   :  { %v1841_v2 = vpop.xlane.xlu0 %1840 }
 0xc86   :  { %v1859_v48 = vsub.f32 %v1583_v63, %v1841_v2 }
 0xc88   :  { %v1869_v53 = vmul.f32 1.442695, %v1859_v48 }
 0xc89   :  { %v1844_v43 = vpop.xlane.xlu0 %1843 }
 0xc8a   :  { %3278 = vpow2.f32 %v1869_v53  ;;  %v1860_v46 = vsub.f32 %v1632_v60, %v1844_v43 }
 0xc8c   :  { %v1871_v32 = vmul.f32 1.442695, %v1860_v46 }
 0xc8d   :  { %v1850_v42 = vpop.xlane.xlu0 %1849  ;;  %v1847_v58 = vpop.xlane.xlu1 %1846 }
 0xc8e   :  { %3280 = vpow2.f32 %v1871_v32  ;;  %v1861_v59 = vsub.f32 %v3878_v12, %v1847_v58  ;;  %v1862_v61 = vsub.f32 %v3881_v16, %v1850_v42 }
 0xc90   :  { %v1873_v62 = vmul.f32 1.442695, %v1861_v59  ;;  %v1875_v9 = vmul.f32 1.442695, %v1862_v61 }
 0xc92   :  { %3282 = vpow2.f32 %v1873_v62 }
 0xc93   :  { %3284 = vpow2.f32 %v1875_v9 }
 0xc95   :  { %v1856_v52 = vpop.xlane.xlu0 %1855  ;;  %v1853_v60 = vpop.xlane.xlu1 %1852 }
 0xc96   :  { %v1863_v4 = vsub.f32 %v1779_v23, %v1853_v60  ;;  %v1864_v6 = vsub.f32 %v1828_v37, %v1856_v52 }
 0xc97   :  { %v3903_v54 = vpop.eup %3278 }
 0xc98   :  { %v1887_v56 = vsel %vm163_vm2, %v3903_v54, 0.0  ;;  %v1877_v5 = vmul.f32 1.442695, %v1863_v4  ;;  %v1879_v8 = vmul.f32 1.442695, %v1864_v6 }
 0xc99   :  { %1888 = vadd.xlane.f32.xlu1 %v1887_v56  ;;  %v1978_v0 = vpop.permute.xlu0 %1977  ;;  %v2026_v10 = vpop.permute.xlu1 %2025 }
 0xc9a   :  { %v1983_v1 = vsel %vm654_vm3, %v1978_v0, 0  ;;  %3286 = vpow2.f32 %v1877_v5  ;;  %v2031_v30 = vsel %vm654_vm3, %v2026_v10, 0 }
 0xc9b   :  { %v3908_v57 = vpop.eup %3280  ;;  %3053 = vmatpush3.bf16.msra.mxu1 %v1983_v1  ;;  %3288 = vpow2.f32 %v1879_v8 }
 0xc9c   :  { %v1890_v63 = vsel %vm163_vm2, %v3908_v57, 0.0  ;;  %3064 = vmatprep.subr.bf16.mxu1 %v3336_v7 }
 0xc9d   :  { %1891 = vadd.xlane.f32.xlu0 %v1890_v63  ;;  %v2074_v14 = vpop.permute.xlu1 %2073 }
 0xc9e   :  { %v2079_v37 = vsel %vm654_vm3, %v2074_v14, 0 }
 0xcaa   :  { %2169 = vrot.lane.b32.xlu1 %v3801_v36, %s3342_s22  ;;  %v3919_v36 = vpop.eup %3282 }
 0xcab   :  { %v3921_v12 = vpop.eup %3284  ;;  %v1893_v16 = vsel %vm163_vm2, %v3919_v36, 0.0 }
 0xcac   :  { %v3925_v20 = vpop.eup %3286  ;;  %v1896_v29 = vsel %vm163_vm2, %v3921_v12, 0.0 }
 0xcad   :  { %v1899_v17 = vsel %vm163_vm2, %v3925_v20, 0.0  ;;  %v3931_v34 = vpop.eup %3288 }
 0xcae   :  { %v1902_v19 = vsel %vm163_vm2, %v3931_v34, 0.0 }
 0xcb3   :  { %2121 = vrot.lane.b32.xlu0 %v3803_v38, %s3342_s22 }
 0xcca   :  { %v1886_v38 = vpop.xlane.xlu0 %1885 }
 0xccb   :  { %3290 = vrcp.f32 %v1886_v38 }
 0xcce   :  { %1894 = vadd.xlane.f32.xlu1 %v1893_v16  ;;  %v1883_v15 = vpop.xlane.xlu1 %1882 }
 0xccf   :  { %3292 = vrcp.f32 %v1883_v15 }
 0xcd2   :  { %1900 = vadd.xlane.f32.xlu1 %v1899_v17  ;;  %1897 = vadd.xlane.f32.xlu0 %v1896_v29  ;;  %v3218_v17 = vld [vmem:[%s4075_s4 + $0x18] sm:$0xff]  }
 0xcd6   :  { %1903 = vadd.xlane.f32.xlu0 %v1902_v19 }
 0xcd8   :  { %v3291_v11 = vpop.eup %3290 }
 0xcd9   :  { %v1914_v22 = vmul.f32 %v3291_v11, %v3275_v49  ;;  %v3219_v11 = vld [vmem:[%s4075_s4 + $0x10] sm:$0xff]  }
 0xcdb   :  { %v1922_v27 = vpack.c.bf16 %v1914_v22, %v1914_v22 }
 0xcdc   :  { %v3293_v23 = vpop.eup %3292 }
 0xcdd   :  { %3055 = vmatmul.mubr.msk.bf16.vlgmr.msra.gmra.mxu1 %vm163_vm2, %v1922_v27  ;;  %v1913_v25 = vmul.f32 %v3293_v23, %v3899_v50 }
 0xcde   :  { %3065 = vmatpush3.bf16.msra.mxu1 %v2079_v37  ;;  %3066 = vmatprep.mubr.msk.bf16.mxu1 %vm3337_vm1, %v3336_v7 }
 0xcdf   :  { %v1921_v26 = vpack.c.bf16 %v1913_v25, %v1913_v25  ;;  %3076 = vmatprep.subr.bf16.mxu1 %v3336_v7 }
 0xce1   :  { %3049 = vmatmul.mubr.msk.bf16.vlgmr.msra.gmra.mxu0 %vm163_vm2, %v1921_v26 }
 0xce2   :  { %3059 = vmatpush3.bf16.msra.mxu0 %v2031_v30  ;;  %3060 = vmatprep.mubr.msk.bf16.mxu0 %vm3337_vm1, %v3336_v7 }
 0xce3   :  { %2265 = vrot.lane.b32.xlu1 %v3812_v3, %s3342_s22  ;;  %3070 = vmatprep.subr.bf16.mxu0 %v3336_v7 }
 0xcec   :  { %2217 = vrot.lane.b32.xlu0 %v3810_v21, %s3342_s22 }
 0xd22   :  { %v1889_v18 = vpop.xlane.xlu1 %1888 }
 0xd23   :  { %3294 = vrcp.f32 %v1889_v18 }
 0xd26   :  { %v1892_v31 = vpop.xlane.xlu0 %1891  ;;  %v2170_v41 = vpop.permute.xlu1 %2169 }
 0xd27   :  { %3296 = vrcp.f32 %v1892_v31  ;;  %v2175_v44 = vsel %vm654_vm3, %v2170_v41, 0 }
 0xd2a   :  { %v2122_v39 = vpop.permute.xlu0 %2121 }
 0xd2b   :  { %v2127_v40 = vsel %vm654_vm3, %v2122_v39, 0 }
 0xd30   :  { %v3295_v33 = vpop.eup %3294 }
 0xd31   :  { %v1915_v35 = vmul.f32 %v3295_v33, %v3903_v54 }
 0xd33   :  { %v1923_v47 = vpack.c.bf16 %v1915_v35, %v1915_v35 }
 0xd34   :  { %v3297_v55 = vpop.eup %3296 }
 0xd35   :  { %3061 = vmatmul.mubr.msk.bf16.vlgmr.msra.gmra.mxu0 %vm163_vm2, %v1923_v47  ;;  %v1916_v3 = vmul.f32 %v3297_v55, %v3908_v57 }
 0xd36   :  { %3071 = vmatpush3.bf16.msra.mxu0 %v2127_v40  ;;  %3072 = vmatprep.mubr.msk.bf16.mxu0 %vm3337_vm1, %v3336_v7 }
 0xd37   :  { %v1924_v21 = vpack.c.bf16 %v1916_v3, %v1916_v3  ;;  %3082 = vmatprep.subr.bf16.mxu0 %v3336_v7 }
 0xd39   :  { %3067 = vmatmul.mubr.msk.bf16.vlgmr.msra.gmra.mxu1 %vm163_vm2, %v1924_v21 }
 0xd3a   :  { %3077 = vmatpush3.bf16.msra.mxu1 %v2175_v44  ;;  %3078 = vmatprep.mubr.msk.bf16.mxu1 %vm3337_vm1, %v3336_v7 }
 0xd3b   :  { %3088 = vmatprep.subr.bf16.mxu1 %v3336_v7 }
 0xd57   :  { %v1895_v45 = vpop.xlane.xlu1 %1894 }
 0xd58   :  { %3298 = vrcp.f32 %v1895_v45 }
 0xd5b   :  { %v1901_v49 = vpop.xlane.xlu1 %1900  ;;  %v1898_v51 = vpop.xlane.xlu0 %1897 }
 0xd5c   :  { %3300 = vrcp.f32 %v1901_v49 }
 0xd5d   :  { %3302 = vrcp.f32 %v1898_v51 }
 0xd5f   :  { %v1904_v50 = vpop.xlane.xlu0 %1903  ;;  %v2266_v52 = vpop.permute.xlu1 %2265 }
 0xd60   :  { %3304 = vrcp.f32 %v1904_v50  ;;  %v2271_v1 = vsel %vm654_vm3, %v2266_v52, 0 }
 0xd63   :  { %v2218_v48 = vpop.permute.xlu0 %2217 }
 0xd64   :  { %v2223_v32 = vsel %vm654_vm3, %v2218_v48, 0 }
 0xd65   :  { %v3299_v13 = vpop.eup %3298 }
 0xd66   :  { %v1917_v2 = vmul.f32 %v3299_v13, %v3919_v36 }
 0xd68   :  { %v1925_v53 = vpack.c.bf16 %v1917_v2, %v1917_v2 }
 0xd69   :  { %v3301_v43 = vpop.eup %3300 }
 0xd6a   :  { %v3303_v46 = vpop.eup %3302  ;;  %3073 = vmatmul.mubr.msk.bf16.vlgmr.msra.gmra.mxu0 %vm163_vm2, %v1925_v53  ;;  %v1919_v54 = vmul.f32 %v3301_v43, %v3925_v20 }
 0xd6b   :  { %3083 = vmatpush3.bf16.msra.mxu0 %v2223_v32  ;;  %v1918_v42 = vmul.f32 %v3303_v46, %v3921_v12  ;;  %3084 = vmatprep.mubr.msk.bf16.mxu0 %vm3337_vm1, %v3336_v7 }
 0xd6c   :  { %3094 = vmatprep.subr.bf16.mxu0 %v3336_v7  ;;  %v1927_v57 = vpack.c.bf16 %v1919_v54, %v1919_v54 }
 0xd6d   :  { %v1926_v56 = vpack.c.bf16 %v1918_v42, %v1918_v42  ;;  %v3305_v0 = vpop.eup %3304 }
 0xd6e   :  { %v1920_v63 = vmul.f32 %v3305_v0, %v3931_v34 }
 0xd6f   :  { %3079 = vmatmul.mubr.msk.bf16.vlgmr.msra.gmra.mxu1 %vm163_vm2, %v1926_v56 }
 0xd70   :  { %3089 = vmatpush3.bf16.msra.mxu1 %v2271_v1  ;;  %3090 = vmatprep.mubr.msk.bf16.mxu1 %vm3337_vm1, %v3336_v7  ;;  %v1928_v58 = vpack.c.bf16 %v1920_v63, %v1920_v63 }
 0xd71   :  { %3102 = vmatprep.subr.bf16.mxu1 %v3336_v7 }
 0xd72   :  { %3085 = vmatmul.mubr.msk.bf16.vlgmr.msra.gmra.mxu0 %vm163_vm2, %v1927_v57 }
 0xd73   :  { %3098 = vmatprep.mubr.msk.bf16.mxu0 %vm3337_vm1, %v3336_v7  ;;  %3095 = vmatpush3.bf16.msra.mxu0 %v3218_v17  ;;  %v2717_v17 = vld [vmem:[%s4076_s5 + $0x1] ss:$0 sm:$0xff] }
 0xd74   :  { %3096 = vmatprep.subr.bf16.mxu0 %v3336_v7 }
 0xd77   :  { %3091 = vmatmul.mubr.msk.bf16.vlgmr.msra.gmra.mxu1 %vm163_vm2, %v1928_v58  ;;  %3097 = vmatpush3.bf16.msra.mxu0 %v3219_v11 }
 0xd78   :  { %3106 = vmatprep.mubr.msk.bf16.mxu1 %vm3337_vm1, %v3336_v7  ;;  %3110 = vmatprep.subr.bf16.mxu0 %v3336_v7 }
 0xd9d   :  { %v2019_v59 = vpop.f32.mrf.mxu1 }
 0xd9f   :  { %v3056_v60 = vpop.f32.mrf.mxu1 }
 0xda1   :  { %v1971_v61 = vpop.f32.mrf.mxu0  ;;  %v2022_v62 = vpop.f32.mrf.mxu1 }
 0xda2   :  { %v3223_v62 = vld [vmem:[%s4078_s7 + $0x70] sm:$0xff]  }
 0xda3   :  { %v3050_v4 = vpop.f32.mrf.mxu0  ;;  %v3057_v9 = vpop.f32.mrf.mxu1 }
 0xda4   :  { %v3224_v4 = vld [vmem:[%s4078_s7 + $0x68] sm:$0xff]   ;;  %v3225_v9 = vld [vmem:[%s4078_s7 + $0x60] sm:$0xff]  }
 0xda5   :  { %v1974_v5 = vpop.f32.mrf.mxu0 }
 0xda6   :  { %v3226_v5 = vld [vmem:[%s4078_s7 + $0x58] sm:$0xff]  }
 0xda7   :  { %v3051_v6 = vpop.f32.mrf.mxu0 }
 0xda8   :  { %v3227_v6 = vld [vmem:[%s4078_s7 + $0x50] sm:$0xff]  }
 0xdf5   :  { %v2067_v8 = vpop.f32.mrf.mxu0 }
 0xdf7   :  { %v3062_v10 = vpop.f32.mrf.mxu0 }
 0xdf9   :  { %v2070_v36 = vpop.f32.mrf.mxu0  ;;  %v2115_v14 = vpop.f32.mrf.mxu1 }
 0xdfa   :  { %v3187_v38 = vpack.i.bf16 %v2115_v14, %v2067_v8 }
 0xdfb   :  { %v3063_v12 = vpop.f32.mrf.mxu0  ;;  %v3068_v16 = vpop.f32.mrf.mxu1 }
 0xdfc   :  { %3188 = vrot.lane.b32.xlu0 %v3187_v38, %s3343_s1 }
 0xdfd   :  { %v2118_v20 = vpop.f32.mrf.mxu1 }
 0xdff   :  { %v3069_v15 = vpop.f32.mrf.mxu1 }
 0xe2a   :  { %v2163_v29 = vpop.f32.mrf.mxu0 }
 0xe2c   :  { %v3074_v34 = vpop.f32.mrf.mxu0 }
 0xe2e   :  { %v2166_v19 = vpop.f32.mrf.mxu0 }
 0xe2f   :  { %v2211_v22 = vpop.f32.mrf.mxu1 }
 0xe30   :  { %v3192_v27 = vpack.i.bf16 %v2211_v22, %v2163_v29  ;;  %v3075_v23 = vpop.f32.mrf.mxu0  ;;  %v3228_v22 = vld [vmem:[%s4078_s7 + $0x48] sm:$0xff]  }
 0xe31   :  { %v3080_v37 = vpop.f32.mrf.mxu1 }
 0xe32   :  { %3193 = vrot.lane.b32.xlu1 %v3192_v27, %s3344_s26  ;;  %v2259_v25 = vpop.f32.mrf.mxu0  ;;  %v3229_v27 = vld [vmem:[%s4078_s7 + $0x40] sm:$0xff]  }
 0xe33   :  { %v2214_v26 = vpop.f32.mrf.mxu1 }
 0xe34   :  { %v3086_v30 = vpop.f32.mrf.mxu0 }
 0xe35   :  { %v3081_v18 = vpop.f32.mrf.mxu1 }
 0xe36   :  { %v2262_v31 = vpop.f32.mrf.mxu0 }
 0xe37   :  { %v2307_v33 = vpop.f32.mrf.mxu1 }
 0xe38   :  { %v3197_v35 = vpack.i.bf16 %v2307_v33, %v2259_v25  ;;  %v3087_v39 = vpop.f32.mrf.mxu0 }
 0xe39   :  { %v3092_v47 = vpop.f32.mrf.mxu1 }
 0xe3a   :  { %3198 = vrot.lane.b32.xlu0 %v3197_v35, %s3345_s27 }
 0xe3b   :  { %v2310_v55 = vpop.f32.mrf.mxu1 }
 0xe3d   :  { %v3093_v40 = vpop.f32.mrf.mxu1 }
 0xe6e   :  { %v3189_v3 = vpop.permute.xlu0 %3188 }
 0xe6f   :  { %v3191_v21 = vunpack.i.h.bf16 %v3189_v3  ;;  %v3190_v44 = vunpack.i.l.bf16 %v3189_v3 }
 0xe71   :  { %v2338_v50 = vsel %vm163_vm2, %v2019_v59, %v3191_v21  ;;  %v2337_v13 = vsel %vm163_vm2, %v1971_v61, %v3190_v44  ;;  %v3222_v61 = vld [vmem:[%s4078_s7 + $0x78] sm:$0xff]  }
 0xea4   :  { %v3194_v41 = vpop.permute.xlu1 %3193 }
 0xea5   :  { %v3196_v45 = vunpack.i.h.bf16 %v3194_v41  ;;  %v3195_v49 = vunpack.i.l.bf16 %v3194_v41 }
 0xea7   :  { %v2340_v53 = vsel %vm1060_vm4, %v2338_v50, %v3196_v45  ;;  %v2339_v43 = vsel %vm1060_vm4, %v2337_v13, %v3195_v49 }
 0xeac   :  { %v3199_v51 = vpop.permute.xlu0 %3198 }
 0xead   :  { %v3201_v2 = vunpack.i.h.bf16 %v3199_v51  ;;  %v3200_v48 = vunpack.i.l.bf16 %v3199_v51 }
 0xeaf   :  { %v2342_v46 = vsel %vm1063_vm5, %v2340_v53, %v3201_v2  ;;  %v2341_v32 = vsel %vm1063_vm5, %v2339_v43, %v3200_v48  ;;  %v2749_v48 = vld [vmem:[%s4079_s8] ss:$0 sm:$0xff] }
 0xeb0   :  { %v2343_v42 = vpack.c.bf16 %v2342_v46, %v2341_v32 }
 0xeb2   :  { %3099 = vmatmul.mubr.msk.bf16.vlgmr.msra.gmra.mxu0 %vm47_vm0, %v2343_v42 }
 0xeb3   :  { %3126 = vmatprep.mubr.msk.bf16.mxu0 %vm3337_vm1, %v3336_v7  ;;  %3111 = vmatpush3.bf16.msra.mxu0 %v3222_v61 }
 0xeb4   :  { %3112 = vmatprep.subr.bf16.mxu0 %v3336_v7 }
 0xeb7   :  { %3113 = vmatpush3.bf16.msra.mxu0 %v3223_v62 }
 0xeb8   :  { %3114 = vmatprep.subr.bf16.mxu0 %v3336_v7 }
 0xebb   :  { %3115 = vmatpush3.bf16.msra.mxu0 %v3224_v4 }
 0xebc   :  { %3116 = vmatprep.subr.bf16.mxu0 %v3336_v7 }
 0xebf   :  { %3117 = vmatpush3.bf16.msra.mxu0 %v3225_v9 }
 0xec0   :  { %3118 = vmatprep.subr.bf16.mxu0 %v3336_v7 }
 0xec3   :  { %3119 = vmatpush3.bf16.msra.mxu0 %v3226_v5 }
 0xec4   :  { %3120 = vmatprep.subr.bf16.mxu0 %v3336_v7 }
 0xec7   :  { %3121 = vmatpush3.bf16.msra.mxu0 %v3227_v6 }
 0xec8   :  { %3122 = vmatprep.subr.bf16.mxu0 %v3336_v7 }
 0xecb   :  { %3123 = vmatpush3.bf16.msra.mxu0 %v3228_v22 }
 0xecc   :  { %3124 = vmatprep.subr.bf16.mxu0 %v3336_v7 }
 0xecf   :  { %3125 = vmatpush3.bf16.msra.mxu0 %v3229_v27 }
 0xf72   :  { %v2398_v52 = vpop.f32.mrf.mxu0 }
 0xf73   :  { %v4003_v54 = vadd.f32 %v2398_v52, %v3757_v28  ;;  %v3220_v28 = vld [vmem:[%s4077_s6 + $0x18] sm:$0xff]  }
 0xf74   :  { %v3100_v56 = vpop.f32.mrf.mxu0  ;;  %3103 = vmatpush3.bf16.msra.mxu1 %v3220_v28 }
 0xf75   :  { %v2409_v0 = vmul.f32 %v4003_v54, %v4003_v54  ;;  %3104 = vmatprep.subr.bf16.mxu1 %v3336_v7 }
 0xf76   :  { %v2401_v1 = vpop.f32.mrf.mxu0 }
 0xf77   :  { %v4008_v57 = vadd.f32 %v2401_v1, %v3762_v24  ;;  %v2411_v63 = vsel %vm47_vm0, %v2409_v0, 0.0  ;;  %v3221_v24 = vld [vmem:[%s4077_s6 + $0x10] sm:$0xff]  }
 0xf78   :  { %2412 = vadd.xlane.f32.xlu1 %v2411_v63  ;;  %v3101_v58 = vpop.f32.mrf.mxu0  ;;  %3105 = vmatpush3.bf16.msra.mxu1 %v3221_v24 }
 0xf79   :  { %v2410_v59 = vmul.f32 %v4008_v57, %v4008_v57 }
 0xf7b   :  { %v2414_v60 = vsel %vm47_vm0, %v2410_v59, 0.0 }
 0xf7c   :  { %2415 = vadd.xlane.f32.xlu0 %v2414_v60 }
0x1001   :  { %v2413_v8 = vpop.xlane.xlu1 %2412 }
0x1002   :  { %v2417_v10 = vmul.f32 0.03125, %v2413_v8 }
0x1004   :  { %v2419_v36 = vadd.f32 1e-06, %v2417_v10 }
0x1005   :  { %v2416_v14 = vpop.xlane.xlu0 %2415 }
0x1006   :  { %3306 = vrsqrt.f32 %v2419_v36  ;;  %v2418_v38 = vmul.f32 0.03125, %v2416_v14 }
0x1008   :  { %v2420_v12 = vadd.f32 1e-06, %v2418_v38 }
0x100a   :  { %3308 = vrsqrt.f32 %v2420_v12 }
0x1013   :  { %v3307_v16 = vpop.eup %3306 }
0x1014   :  { %v2423_v20 = vmul.f32 %v3307_v16, %v4003_v54 }
0x1016   :  { %v2431_v34 = vmul.f32 %v2717_v17, %v2423_v20 }
0x1017   :  { %v3309_v15 = vpop.eup %3308 }
0x1018   :  { %v2424_v29 = vmul.f32 %v3309_v15, %v4008_v57 }
0x101a   :  { %v2432_v19 = vmul.f32 %v2717_v17, %v2424_v29 }
0x101c   :  { %v2433_v11 = vpack.c.bf16 %v2432_v19, %v2431_v34 }
0x101e   :  { %3107 = vmatmul.mubr.msk.bf16.vlgmr.msra.gmra.mxu1 %vm47_vm0, %v2433_v11 }
0x10de   :  { %v2488_v23 = vpop.f32.mrf.mxu1 }
0x10df   :  { %v2495_v26 = vmax.f32 %v2488_v23, 0.0 }
0x10e0   :  { %v3108_v37 = vpop.f32.mrf.mxu1 }
0x10e2   :  { %v2491_v25 = vpop.f32.mrf.mxu1 }
0x10e3   :  { %v2496_v30 = vmax.f32 %v2491_v25, 0.0 }
0x10e4   :  { %v3109_v18 = vpop.f32.mrf.mxu1 }
0x10e5   :  { %v2497_v31 = vpack.c.bf16 %v2496_v30, %v2495_v26 }
0x10e7   :  { %3127 = vmatmul.mubr.bf16.vlgmr.msra.gmra.mxu0 %v2497_v31 }
0x11a7   :  { %v2597_v33 = vpop.f32.mrf.mxu0 }
0x11a8   :  { %v2604_v35 = vadd.f32 %v2597_v33, %v4003_v54 }
0x11a9   :  { %v3128_v39 = vpop.f32.mrf.mxu0 }
0x11aa   :  { %v2607_v47 = vmul.f32 %v2604_v35, %v2604_v35 }
0x11ab   :  { %v2600_v55 = vpop.f32.mrf.mxu0 }
0x11ac   :  { %v2605_v7 = vadd.f32 %v2600_v55, %v4008_v57  ;;  %v2609_v40 = vsel %vm47_vm0, %v2607_v47, 0.0 }
0x11ad   :  { %2610 = vadd.xlane.f32.xlu0 %v2609_v40  ;;  %v3129_v3 = vpop.f32.mrf.mxu0 }
0x11ae   :  { %v2608_v41 = vmul.f32 %v2605_v7, %v2605_v7 }
0x11b0   :  { %v2612_v21 = vsel %vm47_vm0, %v2608_v41, 0.0 }
0x11b1   :  { %2613 = vadd.xlane.f32.xlu1 %v2612_v21 }
0x1236   :  { %v2611_v44 = vpop.xlane.xlu0 %2610 }
0x1237   :  { %v2615_v45 = vmul.f32 0.03125, %v2611_v44 }
0x1239   :  { %v2617_v49 = vadd.f32 1e-06, %v2615_v45 }
0x123a   :  { %v2614_v51 = vpop.xlane.xlu1 %2613 }
0x123b   :  { %3310 = vrsqrt.f32 %v2617_v49  ;;  %v2616_v50 = vmul.f32 0.03125, %v2614_v51 }
0x123d   :  { %v2618_v13 = vadd.f32 1e-06, %v2616_v50 }
0x123f   :  { %3312 = vrsqrt.f32 %v2618_v13 }
0x1248   :  { %v3311_v2 = vpop.eup %3310 }
0x1249   :  { %v2621_v53 = vmul.f32 %v3311_v2, %v2604_v35 }
0x124b   :  { %v2629_v43 = vmul.f32 %v2749_v48, %v2621_v53 }
0x124c   :  { %v3313_v46 = vpop.eup %3312 }
0x124d   :  { %v2622_v32 = vmul.f32 %v3313_v46, %v2605_v7  ;;  %2631 = vst.msk [vmem:[#allocation2] sm:$0xff] %vm47_vm0, %v2629_v43 }
0x124f   :  { %v2630_v42 = vmul.f32 %v2749_v48, %v2622_v32 }
0x1251   :  { %2632 = vst.msk [vmem:[#allocation2 + $0x8] sm:$0xff] %vm47_vm0, %v2630_v42 }
0x1252   :  { %3325 = shalt.err (!%p3322_p4)
}
0x1253   :  { %s3347_s8 = smov 128  }
0x1254   :  { %2644 = dma.vmem_to_hbm [thread:$0]  %s2639_s3, 256, %s4080_s9, [#allocation3], %s3347_s8, %s3347_s8, %s3343_s1  }
0x1255   :  { %3334 = dma.done.wait [#allocation3], 256  }
0x1256   :  { %3335 = vsyncadd [#allocation3], 4294967040 }
0x1257   :  { %2648 = vsyncpa [#allocation3], 1 }

</bundles_post_ra>
